<compile_context>
chip_gen: v6e
topology: v6e:2x2x1
jax: 0.10.0
libtpu: 0.0.40
codegen_flags: <defaults>
</compile_context>

<pallas_src>
import functools

import jax
import jax.numpy as jnp
import numpy as np
from jax.experimental import pallas as pl
from jax.experimental.pallas import tpu as pltpu

BN_EPS = 1e-5
_LANES = 128
_SUBLANES = 8


def _round_up(n, m):
    return ((n + m - 1) // m) * m


def _nbytes(shape, dtype):
    return int(np.prod(shape)) * jnp.dtype(dtype).itemsize


# --------------------------------------------------------------------------------------
# Kernel: one grid step = (one batch tile, one residual block)
# --------------------------------------------------------------------------------------
def _resnet_kernel(xt_ref, w0_ref, b0_ref,
                   w1_ref, b1_ref, w2_ref, b2_ref,
                   hs_ref, ho_ref, wh_ref, bh_ref,
                   out_ref, h_ref, *, n_splits):
    blk = pl.program_id(1)
    cdt = w0_ref.dtype  # bf16 MXU compute dtype; accumulation stays f32

    # Prologue (first block step only): fused first_layer + time-embedding linear.
    # xt = [x, silu(time_emb)]; w0 = [W_first ; W_time]; b0 = b_first + b_time.
    @pl.when(blk == 0)
    def _():
        xt = xt_ref[...].astype(cdt)
        h_ref[...] = (jnp.dot(xt, w0_ref[...], preferred_element_type=jnp.float32)
                      + b0_ref[...])

    # Residual block for this grid step.  BatchNorm1d (eval) is folded into (w1, b1)
    # on the host; dropout = identity (eval).
    w1 = w1_ref[...]
    b1 = b1_ref[...]
    w2 = w2_ref[...]
    b2 = b2_ref[...]

    bb = h_ref.shape[0]
    rows = bb // n_splits
    # Independent row streams: each stream is a serial matmul->relu->matmul chain; two
    # streams keep the MXU push slots full while the other stream is in its VPU epilogue.
    h_parts = [h_ref[s * rows:(s + 1) * rows, :] for s in range(n_splits)]
    z_parts = [jnp.maximum(
        jnp.dot(h.astype(cdt), w1, preferred_element_type=jnp.float32) + b1, 0.0)
        for h in h_parts]
    for s in range(n_splits):
        h_ref[s * rows:(s + 1) * rows, :] = (
            h_parts[s]
            + jnp.dot(z_parts[s].astype(cdt), w2, preferred_element_type=jnp.float32)
            + b2)

    # Head (last block step only): BN (precomputed scale/shift) -> ReLU -> Linear.
    @pl.when(blk == pl.num_programs(1) - 1)
    def _():
        z = jnp.maximum(h_ref[...] * hs_ref[...] + ho_ref[...], 0.0)
        out_ref[...] = (
            jnp.dot(z.astype(cdt), wh_ref[...], preferred_element_type=jnp.float32)
            + bh_ref[...]).astype(out_ref.dtype)


# --------------------------------------------------------------------------------------
# Host-side parameter preparation: BN folding, prologue fusion, lane padding, bf16 cast.
# --------------------------------------------------------------------------------------
def prepare_params(params, weight_dtype=jnp.bfloat16):
    w0, b0 = params["w0"], params["b0"]
    wt, bt = params["wt"], params["bt"]
    d_in, d_main = w0.shape
    d_emb = wt.shape[0]
    n_blocks, _, d_hidden = params["w1"].shape
    d_out = params["wh"].shape[1]

    Kt = _round_up(d_in + d_emb, 16)   # bf16-pack friendly; Mosaic pads the rest in VMEM
    Mp = _round_up(d_main, _LANES)
    Hp = _round_up(d_hidden, _LANES)
    Op = _round_up(d_out, _LANES)

    # Fuse first_layer + time-embedding linear into a single (d_in+d_emb, d_main) matmul.
    w0t = jnp.concatenate([w0, wt], axis=0)
    b0t = b0 + bt

    # Fold each block's BatchNorm1d (eval) into linear_first:
    #   (h*scale + shift) @ W1 + b1 == h @ (diag(scale) @ W1) + (shift @ W1 + b1)
    scale = params["bng"] * jax.lax.rsqrt(params["bnv"] + BN_EPS)        # (nb, 1, d_main)
    shift = params["bnb"] - params["bnm"] * scale
    w1f = params["w1"] * jnp.transpose(scale, (0, 2, 1))                 # scale rows of W1
    b1f = params["b1"] + jnp.einsum("bij,bjk->bik", shift, params["w1"])

    # Head BN cannot be folded into the head linear (ReLU in between) -> scale/shift pair.
    hscale = params["hg"] * jax.lax.rsqrt(params["hv"] + BN_EPS)
    hshift = params["hb"] - params["hm"] * hscale

    def pad2(a, r, c):
        return jnp.pad(a, ((0, r - a.shape[0]), (0, c - a.shape[1])))

    def pad3(a, r, c):
        return jnp.pad(a, ((0, 0), (0, r - a.shape[1]), (0, c - a.shape[2])))

    prepared = {
        "w0t": pad2(w0t, Kt, Mp).astype(weight_dtype),
        "b0t": pad2(b0t, 1, Mp),
        "w1f": pad3(w1f, Mp, Hp).astype(weight_dtype),
        "b1f": pad3(b1f, 1, Hp),
        "w2": pad3(params["w2"], Hp, Mp).astype(weight_dtype),
        "b2": pad3(params["b2"], 1, Mp),
        "hscale": pad2(hscale, 1, Mp),
        "hshift": pad2(hshift, 1, Mp),
        "wh": pad2(params["wh"], Mp, Op).astype(weight_dtype),
        "bh": pad2(params["bh"], 1, Op),
    }
    dims = dict(d_in=d_in, d_emb=d_emb, d_out=d_out,
                Kt=Kt, Mp=Mp, Hp=Hp, Op=Op, n_blocks=n_blocks)
    return prepared, dims


# --------------------------------------------------------------------------------------
# Wrapper
# --------------------------------------------------------------------------------------
def resnet_forward(x, time_emb, params, *, block_batch=256,
                   weight_dtype=jnp.bfloat16, out_dtype=jnp.bfloat16):
    prepared, dims = prepare_params(params, weight_dtype)
    Kt, Mp, Hp, Op = dims["Kt"], dims["Mp"], dims["Hp"], dims["Op"]
    n_blocks = dims["n_blocks"]
    assert n_blocks >= 1, "ResNet needs at least one residual block"

    B = x.shape[0]
    t = time_emb.astype(jnp.float32)
    xt = jnp.concatenate([x.astype(jnp.float32), t * jax.nn.sigmoid(t)], axis=-1)
    # bf16 input + minimal K pad: cuts prologue input HBM traffic ~5x vs f32 + 128-pad.
    xt = jnp.pad(xt, ((0, 0), (0, Kt - xt.shape[1]))).astype(weight_dtype)

    # Batch tile: large (MXU-filling) but always leaving >=2 steps on the parallel axis
    # so both v7x TensorCores get work and the input DMA pipelines.
    bb = min(block_batch, max(_SUBLANES, _round_up(-(-B // 2), _SUBLANES)))
    Bp = _round_up(B, bb)
    if Bp != B:
        xt = jnp.pad(xt, ((0, Bp - B), (0, 0)))
    grid = (Bp // bb, n_blocks)

    n_splits = 2 if (bb % 16 == 0 and bb >= 32) else 1
    kernel = functools.partial(_resnet_kernel, n_splits=n_splits)

    const2 = lambda i, blk: (0, 0)          # resident weights (fetched once)
    batch2 = lambda i, blk: (i, 0)          # batch-tiled input / output
    perblk3 = lambda i, blk: (blk, 0, 0)    # per-block weights streamed over grid axis 1

    in_specs = [
        pl.BlockSpec((bb, Kt), batch2),       # xt
        pl.BlockSpec((Kt, Mp), const2),       # w0t
        pl.BlockSpec((1, Mp), const2),        # b0t
        pl.BlockSpec((None, Mp, Hp), perblk3),  # w1f (one block per step)
        pl.BlockSpec((None, 1, Hp), perblk3),   # b1f
        pl.BlockSpec((None, Hp, Mp), perblk3),  # w2
        pl.BlockSpec((None, 1, Mp), perblk3),   # b2
        pl.BlockSpec((1, Mp), const2),        # hscale
        pl.BlockSpec((1, Mp), const2),        # hshift
        pl.BlockSpec((Mp, Op), const2),       # wh
        pl.BlockSpec((1, Op), const2),        # bh
    ]
    out_specs = pl.BlockSpec((bb, Op), batch2)

    weight_order = ["w0t", "b0t", "w1f", "b1f", "w2", "b2", "hscale", "hshift", "wh", "bh"]
    weights = [prepared[k] for k in weight_order]

    # VMEM budget from what is actually resident: constant weights + ONE block's weight
    # slice (each double-buffered by the pipeline) + bf16 I/O tiles + the f32 h scratch.
    resident = 0
    resident += 2 * (_nbytes((Kt, Mp), weight_dtype) + _nbytes((1, Mp), jnp.float32))
    resident += 2 * (_nbytes((Mp, Hp), weight_dtype) + _nbytes((1, Hp), jnp.float32))
    resident += 2 * (_nbytes((Hp, Mp), weight_dtype) + _nbytes((1, Mp), jnp.float32))
    resident += 2 * 2 * _nbytes((1, Mp), jnp.float32)
    resident += 2 * (_nbytes((Mp, Op), weight_dtype) + _nbytes((1, Op), jnp.float32))
    resident += 2 * _nbytes((bb, Kt), weight_dtype)
    resident += 2 * _nbytes((bb, Op), out_dtype)
    resident += _nbytes((bb, Mp), jnp.float32)

    # Generation-aware cap: ~80% of physical VMEM (64 MiB/TC on v7x, 128 MiB on v5e/v6e).
    try:
        cap = int(0.8 * pltpu.get_tpu_info().vmem_capacity_bytes)
    except Exception:
        cap = 48 * 2**20
    vmem_limit = int(min(cap, max(16 * 2**20, resident + (8 << 20))))

    flops = 2 * Bp * (Kt * Mp + n_blocks * (Mp * Hp + Hp * Mp) + Mp * Op)
    bytes_accessed = (_nbytes((Bp, Kt), weight_dtype) + _nbytes((Bp, Op), out_dtype)
                      + sum(_nbytes(w.shape, w.dtype) for w in weights))
    cost = pl.CostEstimate(flops=flops, transcendentals=0, bytes_accessed=bytes_accessed)

    out = pl.pallas_call(
        kernel,
        out_shape=jax.ShapeDtypeStruct((Bp, Op), out_dtype),
        grid=grid,
        in_specs=in_specs,
        out_specs=out_specs,
        scratch_shapes=[pltpu.VMEM((bb, Mp), jnp.float32)],
        compiler_params=pltpu.CompilerParams(
            dimension_semantics=("parallel", "arbitrary"),
            vmem_limit_bytes=vmem_limit),
        cost_estimate=cost,
    )(xt, *weights)

    return out[:B, :dims["d_out"]].astype(jnp.float32)


# --------------------------------------------------------------------------------------
# Parameters + pure-JAX reference (original, un-folded formulation)
# --------------------------------------------------------------------------------------
def init_params(key, *, d_in, d_emb, d_main, d_hidden, d_out, n_blocks):
    ks = list(jax.random.split(key, 24))
    it = iter(ks)

    def n(shape, s=0.05):
        return jax.random.normal(next(it), shape, jnp.float32) * s

    return {
        "w0": n((d_in, d_main)), "b0": n((1, d_main)),
        "wt": n((d_emb, d_main)), "bt": n((1, d_main)),
        "bng": 1.0 + n((n_blocks, 1, d_main)),
        "bnb": n((n_blocks, 1, d_main)),
        "bnm": n((n_blocks, 1, d_main)),
        "bnv": 0.5 + jnp.abs(n((n_blocks, 1, d_main), 0.3)),
        "w1": n((n_blocks, d_main, d_hidden)), "b1": n((n_blocks, 1, d_hidden)),
        "w2": n((n_blocks, d_hidden, d_main)), "b2": n((n_blocks, 1, d_main)),
        "hg": 1.0 + n((1, d_main)), "hb": n((1, d_main)),
        "hm": n((1, d_main)), "hv": 0.5 + jnp.abs(n((1, d_main), 0.3)),
        "wh": n((d_main, d_out)), "bh": n((1, d_out)),
    }


def resnet_reference(x, time_emb, params):
    """Pure-JAX f32 reference mirroring the PyTorch forward (eval mode)."""
    h = x.astype(jnp.float32) @ params["w0"] + params["b0"]
    t = time_emb.astype(jnp.float32)
    t = t * jax.nn.sigmoid(t)
    h = h + (t @ params["wt"] + params["bt"])
    for blk in range(params["w1"].shape[0]):
        z = (h - params["bnm"][blk]) / jnp.sqrt(params["bnv"][blk] + BN_EPS)
        z = z * params["bng"][blk] + params["bnb"][blk]
        z = jnp.maximum(z @ params["w1"][blk] + params["b1"][blk], 0.0)
        z = z @ params["w2"][blk] + params["b2"][blk]
        h = h + z
    z = (h - params["hm"]) / jnp.sqrt(params["hv"] + BN_EPS)
    z = z * params["hg"] + params["hb"]
    z = jnp.maximum(z, 0.0)
    return z @ params["wh"] + params["bh"]


if __name__ == "__main__":
    # Lane-aligned model dims; B=256 -> 2 batch tiles x n_blocks grid steps.
    B, d_in, d_emb = 256, 16, 32
    d_main, d_hidden, d_out, n_blocks = 128, 256, 8, 2

    root = jax.random.PRNGKey(0)
    k_x, k_t, k_p = jax.random.split(root, 3)
    x = jax.random.normal(k_x, (B, d_in), jnp.float32)
    time_emb = jax.random.normal(k_t, (B, d_emb), jnp.float32)
    params = init_params(k_p, d_in=d_in, d_emb=d_emb, d_main=d_main,
                         d_hidden=d_hidden, d_out=d_out, n_blocks=n_blocks)

    out = resnet_forward(x, time_emb, params)
    out = jax.block_until_ready(out)

    ref = jax.block_until_ready(resnet_reference(x, time_emb, params))
    # Tolerance covers bf16 weight/activation/output rounding vs. the pure-f32 reference.
    np.testing.assert_allclose(np.asarray(out), np.asarray(ref), rtol=2e-2, atol=2e-2)

    print("KERNEL_OK")
</pallas_src>

<mosaic_0001>
module attributes {stable_mosaic.version = 11 : i64} {
  func.func @_resnet_kernel(%arg0: i32, %arg1: i32, %arg2: memref<128x48xbf16, #tpu.memory_space<vmem>>, %arg3: memref<48x128xbf16, #tpu.memory_space<vmem>>, %arg4: memref<1x128xf32, #tpu.memory_space<vmem>>, %arg5: memref<1x128x256xbf16, #tpu.memory_space<vmem>>, %arg6: memref<1x1x256xf32, #tpu.memory_space<vmem>>, %arg7: memref<1x256x128xbf16, #tpu.memory_space<vmem>>, %arg8: memref<1x1x128xf32, #tpu.memory_space<vmem>>, %arg9: memref<1x128xf32, #tpu.memory_space<vmem>>, %arg10: memref<1x128xf32, #tpu.memory_space<vmem>>, %arg11: memref<128x128xbf16, #tpu.memory_space<vmem>>, %arg12: memref<1x128xf32, #tpu.memory_space<vmem>>, %arg13: memref<128x128xbf16, #tpu.memory_space<vmem>>, %arg14: memref<128x128xf32, #tpu.memory_space<vmem>>) attributes {dimension_semantics = [#tpu.dimension_semantics<parallel>, #tpu.dimension_semantics<arbitrary>], iteration_bounds = array<i64: 2, 2>, scalar_prefetch = 0 : i64, scratch_operands = 1 : i64, tpu.core_type = #tpu.core_type<tc>, window_params = [{transform_indices = @transform_0, window_bounds = array<i64: 128, 48>}, {pipeline_mode = #tpu.pipeline_mode<synchronous>, transform_indices = @transform_1, window_bounds = array<i64: 48, 128>}, {pipeline_mode = #tpu.pipeline_mode<synchronous>, transform_indices = @transform_2, window_bounds = array<i64: 1, 128>}, {transform_indices = @transform_3, window_bounds = array<i64: 1, 128, 256>}, {transform_indices = @transform_4, window_bounds = array<i64: 1, 1, 256>}, {transform_indices = @transform_5, window_bounds = array<i64: 1, 256, 128>}, {transform_indices = @transform_6, window_bounds = array<i64: 1, 1, 128>}, {pipeline_mode = #tpu.pipeline_mode<synchronous>, transform_indices = @transform_7, window_bounds = array<i64: 1, 128>}, {pipeline_mode = #tpu.pipeline_mode<synchronous>, transform_indices = @transform_8, window_bounds = array<i64: 1, 128>}, {pipeline_mode = #tpu.pipeline_mode<synchronous>, transform_indices = @transform_9, window_bounds = array<i64: 128, 128>}, {pipeline_mode = #tpu.pipeline_mode<synchronous>, transform_indices = @transform_10, window_bounds = array<i64: 1, 128>}, {transform_indices = @transform_11, window_bounds = array<i64: 128, 128>}]} {
    %c0_i32 = arith.constant 0 : i32
    %0 = arith.cmpi eq, %arg1, %c0_i32 : i32
    %1 = arith.extui %0 : i1 to i32
    %c0_i32_0 = arith.constant 0 : i32
    %2 = arith.cmpi ne, %1, %c0_i32_0 : i32
    scf.if %2 {
      %c0_25 = arith.constant 0 : index
      %c0_26 = arith.constant 0 : index
      %40 = vector.load %arg2[%c0_25, %c0_26] : memref<128x48xbf16, #tpu.memory_space<vmem>>, vector<128x48xbf16>
      %c0_27 = arith.constant 0 : index
      %c0_28 = arith.constant 0 : index
      %41 = vector.load %arg3[%c0_27, %c0_28] : memref<48x128xbf16, #tpu.memory_space<vmem>>, vector<48x128xbf16>
      %cst_29 = arith.constant dense<0.000000e+00> : vector<128x128xf32>
      %42 = tpu.matmul %40, %41, %cst_29 {dimension_numbers = #tpu.dot_dimension_numbers<[1], [0], [0], [1], [0, 0, 1, 1], [], []>} : vector<128x48xbf16>, vector<48x128xbf16>, vector<128x128xf32> -> vector<128x128xf32>
      %c0_30 = arith.constant 0 : index
      %c0_31 = arith.constant 0 : index
      %43 = vector.load %arg4[%c0_30, %c0_31] : memref<1x128xf32, #tpu.memory_space<vmem>>, vector<1x128xf32>
      %44 = vector.broadcast %43 : vector<1x128xf32> to vector<128x128xf32>
      %45 = arith.addf %42, %44 : vector<128x128xf32>
      %c0_32 = arith.constant 0 : index
      %c0_33 = arith.constant 0 : index
      %46 = vector.load %arg14[%c0_32, %c0_33] : memref<128x128xf32, #tpu.memory_space<vmem>>, vector<128x128xf32>
      tpu.vector_store %arg14[%c0_32, %c0_33], %45 {strides = array<i32>} : memref<128x128xf32, #tpu.memory_space<vmem>>, vector<128x128xf32>,
    } else {
    }
    %c0 = arith.constant 0 : index
    %c0_1 = arith.constant 0 : index
    %c0_2 = arith.constant 0 : index
    %3 = vector.load %arg5[%c0, %c0_1, %c0_2] : memref<1x128x256xbf16, #tpu.memory_space<vmem>>, vector<1x128x256xbf16>
    %4 = vector.shape_cast %3 : vector<1x128x256xbf16> to vector<128x256xbf16>
    %c0_3 = arith.constant 0 : index
    %c0_4 = arith.constant 0 : index
    %c0_5 = arith.constant 0 : index
    %5 = vector.load %arg6[%c0_3, %c0_4, %c0_5] : memref<1x1x256xf32, #tpu.memory_space<vmem>>, vector<1x1x256xf32>
    %6 = vector.shape_cast %5 : vector<1x1x256xf32> to vector<1x256xf32>
    %c0_6 = arith.constant 0 : index
    %c0_7 = arith.constant 0 : index
    %c0_8 = arith.constant 0 : index
    %7 = vector.load %arg7[%c0_6, %c0_7, %c0_8] : memref<1x256x128xbf16, #tpu.memory_space<vmem>>, vector<1x256x128xbf16>
    %8 = vector.shape_cast %7 : vector<1x256x128xbf16> to vector<256x128xbf16>
    %c0_9 = arith.constant 0 : index
    %c0_10 = arith.constant 0 : index
    %c0_11 = arith.constant 0 : index
    %9 = vector.load %arg8[%c0_9, %c0_10, %c0_11] : memref<1x1x128xf32, #tpu.memory_space<vmem>>, vector<1x1x128xf32>
    %10 = vector.shape_cast %9 : vector<1x1x128xf32> to vector<1x128xf32>
    %c0_12 = arith.constant 0 : index
    %c0_13 = arith.constant 0 : index
    %11 = vector.load %arg14[%c0_12, %c0_13] : memref<128x128xf32, #tpu.memory_space<vmem>>, vector<64x128xf32>
    %c64 = arith.constant 64 : index
    %c0_14 = arith.constant 0 : index
    %12 = vector.load %arg14[%c64, %c0_14] : memref<128x128xf32, #tpu.memory_space<vmem>>, vector<64x128xf32>
    %13 = arith.truncf %11 : vector<64x128xf32> to vector<64x128xbf16>
    %cst = arith.constant dense<0.000000e+00> : vector<64x256xf32>
    %14 = tpu.matmul %13, %4, %cst {dimension_numbers = #tpu.dot_dimension_numbers<[1], [0], [0], [1], [0, 0, 1, 1], [], []>} : vector<64x128xbf16>, vector<128x256xbf16>, vector<64x256xf32> -> vector<64x256xf32>
    %15 = vector.broadcast %6 : vector<1x256xf32> to vector<64x256xf32>
    %16 = arith.addf %14, %15 : vector<64x256xf32>
    %cst_15 = arith.constant 0.000000e+00 : f32
    %17 = vector.broadcast %cst_15 : f32 to vector<64x256xf32>
    %18 = arith.maximumf %16, %17 : vector<64x256xf32>
    %19 = arith.truncf %12 : vector<64x128xf32> to vector<64x128xbf16>
    %cst_16 = arith.constant dense<0.000000e+00> : vector<64x256xf32>
    %20 = tpu.matmul %19, %4, %cst_16 {dimension_numbers = #tpu.dot_dimension_numbers<[1], [0], [0], [1], [0, 0, 1, 1], [], []>} : vector<64x128xbf16>, vector<128x256xbf16>, vector<64x256xf32> -> vector<64x256xf32>
    %21 = vector.broadcast %6 : vector<1x256xf32> to vector<64x256xf32>
    %22 = arith.addf %20, %21 : vector<64x256xf32>
    %cst_17 = arith.constant 0.000000e+00 : f32
    %23 = vector.broadcast %cst_17 : f32 to vector<64x256xf32>
    %24 = arith.maximumf %22, %23 : vector<64x256xf32>
    %25 = arith.truncf %18 : vector<64x256xf32> to vector<64x256xbf16>
    %cst_18 = arith.constant dense<0.000000e+00> : vector<64x128xf32>
    %26 = tpu.matmul %25, %8, %cst_18 {dimension_numbers = #tpu.dot_dimension_numbers<[1], [0], [0], [1], [0, 0, 1, 1], [], []>} : vector<64x256xbf16>, vector<256x128xbf16>, vector<64x128xf32> -> vector<64x128xf32>
    %27 = arith.addf %11, %26 : vector<64x128xf32>
    %28 = vector.broadcast %10 : vector<1x128xf32> to vector<64x128xf32>
    %29 = arith.addf %27, %28 : vector<64x128xf32>
    %c0_19 = arith.constant 0 : index
    %c0_20 = arith.constant 0 : index
    %30 = vector.load %arg14[%c0_19, %c0_20] : memref<128x128xf32, #tpu.memory_space<vmem>>, vector<64x128xf32>
    tpu.vector_store %arg14[%c0_19, %c0_20], %29 {strides = array<i32>} : memref<128x128xf32, #tpu.memory_space<vmem>>, vector<64x128xf32>,
    %31 = arith.truncf %24 : vector<64x256xf32> to vector<64x256xbf16>
    %cst_21 = arith.constant dense<0.000000e+00> : vector<64x128xf32>
    %32 = tpu.matmul %31, %8, %cst_21 {dimension_numbers = #tpu.dot_dimension_numbers<[1], [0], [0], [1], [0, 0, 1, 1], [], []>} : vector<64x256xbf16>, vector<256x128xbf16>, vector<64x128xf32> -> vector<64x128xf32>
    %33 = arith.addf %12, %32 : vector<64x128xf32>
    %34 = vector.broadcast %10 : vector<1x128xf32> to vector<64x128xf32>
    %35 = arith.addf %33, %34 : vector<64x128xf32>
    %c64_22 = arith.constant 64 : index
    %c0_23 = arith.constant 0 : index
    %36 = vector.load %arg14[%c64_22, %c0_23] : memref<128x128xf32, #tpu.memory_space<vmem>>, vector<64x128xf32>
    tpu.vector_store %arg14[%c64_22, %c0_23], %35 {strides = array<i32>} : memref<128x128xf32, #tpu.memory_space<vmem>>, vector<64x128xf32>,
    %c1_i32 = arith.constant 1 : i32
    %37 = arith.cmpi eq, %arg1, %c1_i32 : i32
    %38 = arith.extui %37 : i1 to i32
    %c0_i32_24 = arith.constant 0 : i32
    %39 = arith.cmpi ne, %38, %c0_i32_24 : i32
    scf.if %39 {
      %c0_25 = arith.constant 0 : index
      %c0_26 = arith.constant 0 : index
      %40 = vector.load %arg14[%c0_25, %c0_26] : memref<128x128xf32, #tpu.memory_space<vmem>>, vector<128x128xf32>
      %c0_27 = arith.constant 0 : index
      %c0_28 = arith.constant 0 : index
      %41 = vector.load %arg9[%c0_27, %c0_28] : memref<1x128xf32, #tpu.memory_space<vmem>>, vector<1x128xf32>
      %42 = vector.broadcast %41 : vector<1x128xf32> to vector<128x128xf32>
      %43 = arith.mulf %40, %42 : vector<128x128xf32>
      %c0_29 = arith.constant 0 : index
      %c0_30 = arith.constant 0 : index
      %44 = vector.load %arg10[%c0_29, %c0_30] : memref<1x128xf32, #tpu.memory_space<vmem>>, vector<1x128xf32>
      %45 = vector.broadcast %44 : vector<1x128xf32> to vector<128x128xf32>
      %46 = arith.addf %43, %45 : vector<128x128xf32>
      %cst_31 = arith.constant 0.000000e+00 : f32
      %47 = vector.broadcast %cst_31 : f32 to vector<128x128xf32>
      %48 = arith.maximumf %46, %47 : vector<128x128xf32>
      %49 = arith.truncf %48 : vector<128x128xf32> to vector<128x128xbf16>
      %c0_32 = arith.constant 0 : index
      %c0_33 = arith.constant 0 : index
      %50 = vector.load %arg11[%c0_32, %c0_33] : memref<128x128xbf16, #tpu.memory_space<vmem>>, vector<128x128xbf16>
      %cst_34 = arith.constant dense<0.000000e+00> : vector<128x128xf32>
      %51 = tpu.matmul %49, %50, %cst_34 {dimension_numbers = #tpu.dot_dimension_numbers<[1], [0], [0], [1], [0, 0, 1, 1], [], []>} : vector<128x128xbf16>, vector<128x128xbf16>, vector<128x128xf32> -> vector<128x128xf32>
      %c0_35 = arith.constant 0 : index
      %c0_36 = arith.constant 0 : index
      %52 = vector.load %arg12[%c0_35, %c0_36] : memref<1x128xf32, #tpu.memory_space<vmem>>, vector<1x128xf32>
      %53 = vector.broadcast %52 : vector<1x128xf32> to vector<128x128xf32>
      %54 = arith.addf %51, %53 : vector<128x128xf32>
      %55 = arith.truncf %54 : vector<128x128xf32> to vector<128x128xbf16>
      %c0_37 = arith.constant 0 : index
      %c0_38 = arith.constant 0 : index
      %56 = vector.load %arg13[%c0_37, %c0_38] : memref<128x128xbf16, #tpu.memory_space<vmem>>, vector<128x128xbf16>
      tpu.vector_store %arg13[%c0_37, %c0_38], %55 {strides = array<i32>} : memref<128x128xbf16, #tpu.memory_space<vmem>>, vector<128x128xbf16>,
    } else {
    }
    return
  }
  func.func @transform_0(%arg0: i32, %arg1: i32) -> (i32, i32) {
    %c0_i32 = arith.constant 0 : i32
    %c0_i32_0 = arith.constant 0 : i32
    return %arg0, %c0_i32 : i32, i32
  }
  func.func @transform_1(%arg0: i32, %arg1: i32) -> (i32, i32) {
    %c0_i32 = arith.constant 0 : i32
    %c0_i32_0 = arith.constant 0 : i32
    %c0_i32_1 = arith.constant 0 : i32
    return %c0_i32, %c0_i32_0 : i32, i32
  }
  func.func @transform_2(%arg0: i32, %arg1: i32) -> (i32, i32) {
    %c0_i32 = arith.constant 0 : i32
    %c0_i32_0 = arith.constant 0 : i32
    %c0_i32_1 = arith.constant 0 : i32
    return %c0_i32, %c0_i32_0 : i32, i32
  }
  func.func @transform_3(%arg0: i32, %arg1: i32) -> (i32, i32, i32) {
    %c0_i32 = arith.constant 0 : i32
    %c0_i32_0 = arith.constant 0 : i32
    %c0_i32_1 = arith.constant 0 : i32
    return %arg1, %c0_i32, %c0_i32_0 : i32, i32, i32
  }
  func.func @transform_4(%arg0: i32, %arg1: i32) -> (i32, i32, i32) {
    %c0_i32 = arith.constant 0 : i32
    %c0_i32_0 = arith.constant 0 : i32
    %c0_i32_1 = arith.constant 0 : i32
    return %arg1, %c0_i32, %c0_i32_0 : i32, i32, i32
  }
  func.func @transform_5(%arg0: i32, %arg1: i32) -> (i32, i32, i32) {
    %c0_i32 = arith.constant 0 : i32
    %c0_i32_0 = arith.constant 0 : i32
    %c0_i32_1 = arith.constant 0 : i32
    return %arg1, %c0_i32, %c0_i32_0 : i32, i32, i32
  }
  func.func @transform_6(%arg0: i32, %arg1: i32) -> (i32, i32, i32) {
    %c0_i32 = arith.constant 0 : i32
    %c0_i32_0 = arith.constant 0 : i32
    %c0_i32_1 = arith.constant 0 : i32
    return %arg1, %c0_i32, %c0_i32_0 : i32, i32, i32
  }
  func.func @transform_7(%arg0: i32, %arg1: i32) -> (i32, i32) {
    %c0_i32 = arith.constant 0 : i32
    %c0_i32_0 = arith.constant 0 : i32
    %c0_i32_1 = arith.constant 0 : i32
    return %c0_i32, %c0_i32_0 : i32, i32
  }
  func.func @transform_8(%arg0: i32, %arg1: i32) -> (i32, i32) {
    %c0_i32 = arith.constant 0 : i32
    %c0_i32_0 = arith.constant 0 : i32
    %c0_i32_1 = arith.constant 0 : i32
    return %c0_i32, %c0_i32_0 : i32, i32
  }
  func.func @transform_9(%arg0: i32, %arg1: i32) -> (i32, i32) {
    %c0_i32 = arith.constant 0 : i32
    %c0_i32_0 = arith.constant 0 : i32
    %c0_i32_1 = arith.constant 0 : i32
    return %c0_i32, %c0_i32_0 : i32, i32
  }
  func.func @transform_10(%arg0: i32, %arg1: i32) -> (i32, i32) {
    %c0_i32 = arith.constant 0 : i32
    %c0_i32_0 = arith.constant 0 : i32
    %c0_i32_1 = arith.constant 0 : i32
    return %c0_i32, %c0_i32_0 : i32, i32
  }
  func.func @transform_11(%arg0: i32, %arg1: i32) -> (i32, i32) {
    %c0_i32 = arith.constant 0 : i32
    %c0_i32_0 = arith.constant 0 : i32
    return %arg0, %c0_i32 : i32, i32
  }
}

</mosaic_0001>

<bundles_post_ra>
// kernel: tpu_custom_call.1
= control target key start
LH: loop header
LB: loop body
LE: loop exit
PB: predicated region body
PF: predicated region fallthrough
CT: control target
= control target key end

     0   :  { %s3172_s0 = inlined_call_operand.vmem [shape: bf16[256,48], index: 0, kind: input, shape index: {}]   ;;  %s3173_s1 = inlined_call_operand.vmem [shape: bf16[48,128], index: 1, kind: input, shape index: {}]   ;;  %s3174_s2 = inlined_call_operand.vmem [shape: f32[1,128], index: 2, kind: input, shape index: {}]   ;;  %s3175_s3 = inlined_call_operand.hbm [shape: bf16[2,128,256], index: 3, kind: input, shape index: {}]   ;;  %s3176_s4 = inlined_call_operand.vmem [shape: f32[2,1,256], index: 4, kind: input, shape index: {}]   ;;  %s3177_s5 = inlined_call_operand.hbm [shape: bf16[2,256,128], index: 5, kind: input, shape index: {}]   ;;  %s3178_s6 = inlined_call_operand.vmem [shape: f32[2,1,128], index: 6, kind: input, shape index: {}]   ;;  %s3179_s7 = inlined_call_operand.vmem [shape: f32[1,128], index: 7, kind: input, shape index: {}]   ;;  %s3180_s8 = inlined_call_operand.vmem [shape: f32[1,128], index: 8, kind: input, shape index: {}]   ;;  %s3181_s9 = inlined_call_operand.vmem [shape: bf16[128,128], index: 9, kind: input, shape index: {}]   ;;  %s3182_s10 = inlined_call_operand.vmem [shape: f32[1,128], index: 10, kind: input, shape index: {}]   ;;  %s3183_s11 = inlined_call_operand.hbm [shape: bf16[256,128], index: 11, kind: output, shape index: {}]  }
   0x1   :  { %3197 = sst [smem:[#allocation23_spill]] %s3175_s3 }
   0x2   :  { %3198 = sst [smem:[#allocation24_spill]] %s3180_s8 }
   0x3   :  { %3199 = sst [smem:[#allocation25_spill]] %s3182_s10 }
   0x4   :  { %3200 = sst [smem:[#allocation26_spill]] %s3183_s11 }
   0x5   :  { %16 = vsyncpa [#allocation4], 0 }
   0x6   :  { %18 = vsyncpa [#allocation4 + $0x1], 0 }
   0x7   :  { %19 = vsyncpa [#allocation7], 0 }
   0x8   :  { %21 = vsyncpa [#allocation7 + $0x1], 0 }
   0x9   :  { %22 = vsyncpa [#allocation5], 0 }
   0xa   :  { %24 = vsyncpa [#allocation5 + $0x1], 0  ;;  %s2650_s17 = smov 0   ;;  %s2652_s18 = smov 0  }
   0xb   :  { %s2654_s19 = smov 0   ;;  %s2656_s20 = smov 0  }
   0xc   :  { %s2658_s21 = smov 0   ;;  %s2660_s22 = smov 0  }
   0xd   :  { %s2662_s23 = smov 0   ;;  %s2664_s24 = smov 0  }
   0xe   :  { %s2666_s25 = smov 0   ;;  %s2668_s26 = smov 0  }
   0xf   :  { %s2670_s27 = smov 0  }
  0x10 LB: > { %3201 = sst [smem:[#allocation12_spill]] %s2538_s17  ;;  %s1872_s28 = sadd.s32 4294967295, %s2578_s27   ;;  %s2578_s27 = sphi %s2670_s27, %s30_s27   ;;  %s2574_s26 = sphi %s2668_s26, %s3234_s26   ;;  %s2570_s25 = sphi %s2666_s25, %s3233_s25   ;;  %s2566_s24 = sphi %s2664_s24, %s3240_s24   ;;  %s2562_s23 = sphi %s2662_s23, %s3239_s23   ;;  %s2558_s22 = sphi %s2660_s22, %s3230_s22   ;;  %s2554_s21 = sphi %s2658_s21, %s3238_s21   ;;  %s2550_s20 = sphi %s2656_s20, %s3237_s20   ;;  %s2546_s19 = sphi %s2654_s19, %s3228_s19   ;;  %s2542_s18 = sphi %s2652_s18, %s3236_s18   ;;  %s2538_s17 = sphi %s2650_s17, %s3235_s17  }
  0x11   : > { %3202 = sst [smem:[#allocation13_spill]] %s2546_s19  ;;  %s1873_s29 = sadd.s32 4294967294, %s2578_s27  }
  0x12   : > { %3203 = sst [smem:[#allocation14_spill]] %s2558_s22  ;;  %s39_s30 = sadd.s32 1, %s2570_s25 }
  0x13   : > { %3204 = sst [smem:[#allocation15_spill]] %s2570_s25  ;;  %s42_s12 = sadd.s32 1, %s2574_s26 }
  0x14   : > { %3205 = sst [smem:[#allocation16_spill]] %s2574_s26  ;;  %p40_p0 = scmp.ge.s32.totalorder %s39_s30, 2 }
  0x15   : > { %s117_s13 = sadd.s32 1, %s2558_s22  ;;  %p124_p1 = scmp.ne.s32.totalorder %s2558_s22, %s2554_s21 }
  0x16   : > { %p125_p2 = scmp.eq.s32.totalorder %s2578_s27, 0  ;;  %s3242_s30 = smov (%p40_p0, %s39_s30), 0 }
  0x17   : > { %3206 = sst [smem:[#allocation17_spill]] %s3242_s30  ;;  %s3244_s12 = smov (!%p40_p0, %s42_s12), %s2574_s26 }
  0x18   : > { %s114_s14 = ssub.s32 %s2570_s25, %s3242_s30  ;;  %p2716_p3 = por %p125_p2, %p124_p1 }
  0x19   : > { %p44_p4 = scmp.ge.s32.totalorder %s3244_s12, 2  ;;  %p115_p5 = scmp.eq.s32.totalorder %s114_s14, 0 }
  0x1a   : > { %p130_p6 = scmp.ne.s32.totalorder %s2554_s21, %s2550_s20  ;;  %p131_p7 = scmp.eq.s32.totalorder %s1872_s28, 0 }
  0x1b   : > { %s3246_s12 = smov (%p44_p4, %s3244_s12), 0  ;;  %s305_s10 = sadd.s32 1, %s2546_s19 }
  0x1c   : > { %3208 = sst [smem:[#allocation18_spill]] %s3246_s12  ;;  %p2726_p8 = por %p131_p7, %p130_p6 }
  0x1d   : > { %s2724_s16 = scalar_select %p115_p5, %s2558_s22, %s117_s13  }
  0x1e   : > { %s302_s11 = ssub.s32 %s2574_s26, %s3246_s12  ;;  %p315_p10 = scmp.ne.s32.totalorder %s2546_s19, %s2542_s18 }
  0x1f   : > { %3209 = sst [smem:[#allocation19_spill]] %s2724_s16  ;;  %p303_p9 = scmp.eq.s32.totalorder %s302_s11, 0 }
  0x20   : > { %p316_p11 = scmp.eq.s32.totalorder %s1872_s28, 3  ;;  %p321_p13 = scmp.ne.s32.totalorder %s2542_s18, %s2538_s17 }
  0x21   : > { %s2736_s14 = scalar_select %p303_p9, %s2546_s19, %s305_s10  }
  0x22   : > { %p2738_p12 = por %p316_p11, %p315_p10  ;;  %p322_p0 = scmp.eq.s32.totalorder %s1873_s29, 3 }
  0x23   : > { %3211 = sst [smem:[#allocation20_spill]] %s2736_s14  ;;  %p2242_p1 = scmp.lt.s32.totalorder %s2578_s27, 4 }
  0x24   : > { %s3212_s20 = scalar_select %p2738_p12, 1, 0 }
  0x25   : > { %s2746_s13 = sand.u32 1, %s2558_s22   ;;  %p2748_p2 = por %p322_p0, %p321_p13 }
  0x26   : > { %3213 = sst [smem:[#allocation21_spill]] %s3212_s20  ;;  %s3191_s12 = sshll.u32 %s2746_s13, 7 }
  0x27   : > { %s3214_s11 = scalar_select %p2748_p2, 1, 0 }
  0x28   : > { %s1976_s28 = sshll.u32 %s2570_s25, 11  ;;  %s3216_s3 = sld [smem:[#allocation23_spill]] }
  0x29   : > { %3215 = sst [smem:[#allocation22_spill]] %s3214_s11  ;;  %s373_s14 = scalar_lea.vmem [#allocation3], %s3191_s12 }
  0x2a   : > { %s380_s19 = sshll.u32 %s373_s14, 4  ;;  %p2761_p4 = pnand %p2242_p1, %p2716_p3  ;;  %s381_s19 = int_to_ptr.vmem [resolvable:$true] %s380_s19 }
  0x2b   : > { %s370_s22 = scalar_lea.sflag [#allocation4], %s2746_s13  ;;  %s2411_s11 = scalar_lea.vmem %s381_s19, 2048 }
  0x2c   : > { %p2400_p5 = pneg %p2761_p4  ;;  %p2412_p6 = scmp.ne.s32.totalorder %s381_s19, %s2411_s11 }
  0x2d   : > { %s2580_s26 = smov [#allocation3]  }
  0x2e   : > { %s379_s16 = scalar_lea.hbm %s3216_s3, %s1976_s28  ;;  %p2414_p7 = pnand %p2412_p6, %p2400_p5 }
  0x2f   : > { %s2416_s10 = sshll.u32 %s2580_s26, 4  ;;  %s2417_s10 = int_to_ptr.vmem [resolvable:$false] %s2416_s10 }
  0x30   : > { %p2415_p9 = pneg %p2414_p7  ;;  %s2418_s15 = scalar_lea.vmem %s2417_s10, 4096 }
  0x31   : > { %p2419_p3 = scmp.lt.s32.totalorder %s381_s19, %s2417_s10  ;;  %p2420_p10 = scmp.lt.s32.totalorder %s2418_s15, %s2411_s11 }
  0x33   : > { %p2421_p11 = por %p2420_p10, %p2419_p3 }
  0x35   : > { %p2422_p13 = pnand %p2421_p11, %p2415_p9 }
  0x37   : > { %2425 = shalt.err (!%p2422_p13)
}
  0x38   : > { %s2581_s14 = smov 128   ;;  %s2582_s12 = smov 8  }
  0x39   : > { %2234 = dma.hbm_to_vmem [thread:$0]  (!%p2761_p4), %s379_s16, 2048, %s381_s19, %s370_s22, %s2581_s14, %s2581_s14, %s2582_s12  }
  0x3a   : > { %p1882_p0 = scmp.ge.s32.totalorder %s2578_s27, 1  ;;  %p422_p1 = scmp.lt.s32.totalorder %s2578_s27, 5 }
  0x3b   : > { %s407_s15 = scalar_lea.hbm %s3177_s5, %s1976_s28  ;;  %s3219_s3 = sshll.u32 %s2746_s13, 7 }
  0x3c   : > { %p2775_p6 = pnand %p1882_p0, %p422_p1  ;;  %s401_s25 = scalar_lea.vmem [#allocation6], %s3219_s3 }
  0x3d   : > { %s408_s17 = sshll.u32 %s401_s25, 4  ;;  %s398_s20 = scalar_lea.sflag [#allocation7], %s2746_s13  ;;  %s409_s17 = int_to_ptr.vmem [resolvable:$true] %s408_s17 }
  0x3e   : > { %s2439_s8 = scalar_lea.vmem %s409_s17, 2048  ;;  %s2583_s19 = smov [#allocation6]  }
  0x3f   : > { %p2440_p7 = scmp.ne.s32.totalorder %s409_s17, %s2439_s8  ;;  %s2444_s22 = sshll.u32 %s2583_s19, 4  ;;  %s2445_s22 = int_to_ptr.vmem [resolvable:$false] %s2444_s22 }
  0x40   : > { %s2446_s12 = scalar_lea.vmem %s2445_s22, 4096  ;;  %p2447_p10 = scmp.lt.s32.totalorder %s409_s17, %s2445_s22 }
  0x41   : > { %p2442_p9 = pnand %p2440_p7, %p2400_p5  ;;  %p2448_p11 = scmp.lt.s32.totalorder %s2446_s12, %s2439_s8 }
  0x43   : > { %p2443_p3 = pneg %p2442_p9  ;;  %p2449_p13 = por %p2448_p11, %p2447_p10 }
  0x45   : > { %p2450_p0 = pnand %p2449_p13, %p2443_p3 }
  0x47   : > { %2453 = shalt.err (!%p2450_p0)
}
  0x48   : > { %s2584_s16 = smov 64   ;;  %s2585_s3 = smov 4  }
  0x49   : > { %2237 = dma.hbm_to_vmem [thread:$0]  (!%p2761_p4), %s407_s15, 2048, %s409_s17, %s398_s20, %s2584_s16, %s2584_s16, %s2585_s3  }
  0x4a   : > { %426 = sbr.rel (%p2775_p6) target bundleno = 1056 (0x420), region = 64  ;;  %s428_s25 = sand.u32 (!%p2775_p6), 1, %s2554_s21  }
  0x4b   : > { %s1883_s13 = sshll.u32 (!%p2775_p6), %s428_s25, 7  ;;  %s429_s28 = scalar_lea.sflag (!%p2775_p6), [#allocation4], %s428_s25 }
  0x4c   : > { %s2793_s14 = scalar_lea.vmem (!%p2775_p6), [#allocation3], %s1883_s13 }
  0x4f   : > { %2525 = dma.done.wait (%p2726_p8), %s429_s28, 2048  }
  0x50   : > { %2527 = vsyncadd (%p2726_p8), %s429_s28, 4294965248  ;;  %s438_s8 = scalar_lea.sflag [#allocation7], %s428_s25  ;;  %s2799_s11 = scalar_lea.vmem [#allocation6], %s1883_s13 }
  0x51   : > { %2529 = dma.done.wait (%p2726_p8), %s438_s8, 2048  }
  0x52   : > { %2531 = vsyncadd (%p2726_p8), %s438_s8, 4294965248  ;;  %s3196_s17 = sand.u32 1, %s2542_s18   ;;  %s1886_s20 = sshll.u32 %s2566_s24, 4 }
  0x53   : > { %s1885_s29 = sshll.u32 %s3196_s17, 6  ;;  %p498_p4 = scmp.lt.s32.totalorder %s1886_s20, 31 }
  0x54   : > { %p503_p5 = scmp.lt.s32.totalorder %s2562_s23, 1  ;;  %s2828_s8 = scalar_lea.vmem [#allocation8], %s1885_s29 }
  0x55   : > { %s3248_s20 = smov (!%p498_p4, %s1886_s20), 31  ;;  %p1889_p8 = scmp.ne.s32.totalorder %s2562_s23, 0 }
  0x56   : > { %s2811_s26 = scalar_select %p503_p5, %s2562_s23, 1 }
  0x57   : > { %s1887_s10 = sshll.u32 %s3248_s20, 2  ;;  %515 = sbr.rel (%p1889_p8) target bundleno = 315 (0x13b), region = 76 }
  0x58   : > { %s2816_s19 = scalar_lea.vmem %s3172_s0, %s1887_s10  ;;  %s1888_s22 = sshll.u32 %s2811_s26, 1 }
  0x59   : > { %s2822_s3 = scalar_lea.vmem %s3176_s4, %s1888_s22  ;;  %s509_s28 = scalar_lea.vmem %s3178_s6, %s2811_s26 }
  0x5c   : > { %v2339_v0 = vld [vmem:[%s3173_s1 + $0x10] sm:$0xff]   ;;  %v2340_v1 = vld [vmem:[%s3173_s1 + $0x8] sm:$0xff]   ;;  %v2341_v2 = vld [vmem:[%s3173_s1] sm:$0xff]   ;;  %vm603_vm0 = vcmask 392192  }
  0x5d   : > { %2149 = vmatprep.subr.bf16.mxu0 %v2339_v0  ;;  %2203 = vmatprep.subr.bf16.mxu1 %v2339_v0  ;;  %v2342_v3 = vld [vmem:[%s2816_s19] sm:$0xff]   ;;  %v2344_v5 = vld [vmem:[%s2816_s19 + $0x8] sm:$0xff]   ;;  %v2346_v7 = vld [vmem:[%s2816_s19 + $0x10] sm:$0xff]  }
  0x5e   : > { %2150 = vmatpush3.bf16.msra.mxu0 %v2339_v0  ;;  %2206 = vmatpush3.bf16.msra.mxu1 %v2339_v0  ;;  %v2343_v4 = vld [vmem:[%s2816_s19 + $0x20] sm:$0xff]   ;;  %v2345_v6 = vld [vmem:[%s2816_s19 + $0x28] sm:$0xff]   ;;  %v2347_v8 = vld [vmem:[%s2816_s19 + $0x30] sm:$0xff]  }
  0x5f   : > { %2151 = vmatprep.subr.bf16.mxu0 %v2340_v1  ;;  %2204 = vmatprep.subr.bf16.mxu1 %v2340_v1  ;;  %v2348_v9 = vld [vmem:[%s2816_s19 + $0x18] sm:$0xff]   ;;  %v1890_v11 = vld [vmem:[%s3174_s2] ss:$0 sm:$0xff] }
  0x60   : > { %2155 = vmatprep.mubr.msk.bf16.mxu0 %vm603_vm0, %v2342_v3  ;;  %2163 = vmatprep.mubr.msk.bf16.mxu1 %vm603_vm0, %v2343_v4  ;;  %v2349_v10 = vld [vmem:[%s2816_s19 + $0x38] sm:$0xff]  }
  0x62   : > { %2152 = vmatpush3.bf16.msra.mxu0 %v2340_v1  ;;  %2207 = vmatpush3.bf16.msra.mxu1 %v2340_v1 }
  0x63   : > { %2153 = vmatprep.subr.bf16.mxu0 %v2341_v2  ;;  %2205 = vmatprep.subr.bf16.mxu1 %v2341_v2 }
  0x66   : > { %2154 = vmatpush3.bf16.msra.mxu0 %v2341_v2  ;;  %2208 = vmatpush3.bf16.msra.mxu1 %v2341_v2 }
  0x69   : > { %2156 = vmatmul.mubr.msk.bf16.vlgmr.msra.gmra.mxu0 %vm603_vm0, %v2344_v5  ;;  %2164 = vmatmul.mubr.msk.bf16.vlgmr.msra.gmra.mxu1 %vm603_vm0, %v2345_v6 }
  0x6a   : > { %2159 = vmatprep.mubr.msk.bf16.mxu0 %vm603_vm0, %v2346_v7  ;;  %2167 = vmatprep.mubr.msk.bf16.mxu1 %vm603_vm0, %v2347_v8 }
  0x71   : > { %2160 = vmatmul.mubr.msk.bf16.gmra.mxu0 %vm603_vm0, %v2348_v9  ;;  %2168 = vmatmul.mubr.msk.bf16.gmra.mxu1 %vm603_vm0, %v2349_v10 }
 0x129   : > { %v2157_v12 = vpop.f32.mrf.mxu0  ;;  %v2165_v13 = vpop.f32.mrf.mxu1 }
 0x12a   : > { %v671_v14 = vadd.f32 %v2157_v12, %v1890_v11  ;;  %v703_v15 = vadd.f32 %v2165_v13, %v1890_v11 }
 0x12b   : > { %v662_v16 = vpop.f32.mrf.mxu0  ;;  %v694_v17 = vpop.f32.mrf.mxu1 }
 0x12c   : > { %727 = vst [vmem:[#allocation2 + $0x58] sm:$0xff] %v671_v14  ;;  %735 = vst [vmem:[#allocation2 + $0x10] sm:$0xff] %v703_v15  ;;  %v663_v18 = vadd.f32 %v1890_v11, %v662_v16  ;;  %v695_v19 = vadd.f32 %v1890_v11, %v694_v17 }
 0x12d   : > { %v2158_v20 = vpop.f32.mrf.mxu0  ;;  %v2166_v21 = vpop.f32.mrf.mxu1 }
 0x12e   : > { %725 = vst [vmem:[#allocation2 + $0x30] sm:$0xff] %v663_v18  ;;  %733 = vst [vmem:[#allocation2 + $0x40] sm:$0xff] %v695_v19  ;;  %v674_v22 = vadd.f32 %v2158_v20, %v1890_v11  ;;  %v706_v23 = vadd.f32 %v2166_v21, %v1890_v11 }
 0x12f   : > { %v665_v24 = vpop.f32.mrf.mxu0  ;;  %v697_v25 = vpop.f32.mrf.mxu1 }
 0x130   : > { %728 = vst [vmem:[#allocation2 + $0x18] sm:$0xff] %v674_v22  ;;  %736 = vst [vmem:[#allocation2 + $0x38] sm:$0xff] %v706_v23  ;;  %v666_v26 = vadd.f32 %v1890_v11, %v665_v24  ;;  %v698_v27 = vadd.f32 %v1890_v11, %v697_v25 }
 0x131   : > { %v2161_v28 = vpop.f32.mrf.mxu0  ;;  %v2169_v29 = vpop.f32.mrf.mxu1 }
 0x132   : > { %726 = vst [vmem:[#allocation2] sm:$0xff] %v666_v26  ;;  %734 = vst [vmem:[#allocation2 + $0x20] sm:$0xff] %v698_v27  ;;  %v687_v30 = vadd.f32 %v2161_v28, %v1890_v11  ;;  %v719_v31 = vadd.f32 %v2169_v29, %v1890_v11 }
 0x133   : > { %v678_v32 = vpop.f32.mrf.mxu0  ;;  %v710_v33 = vpop.f32.mrf.mxu1 }
 0x134   : > { %731 = vst [vmem:[#allocation2 + $0x8] sm:$0xff] %v687_v30  ;;  %739 = vst [vmem:[#allocation2 + $0x78] sm:$0xff] %v719_v31  ;;  %v679_v34 = vadd.f32 %v1890_v11, %v678_v32  ;;  %v711_v35 = vadd.f32 %v1890_v11, %v710_v33 }
 0x135   : > { %v2162_v36 = vpop.f32.mrf.mxu0  ;;  %v2170_v37 = vpop.f32.mrf.mxu1 }
 0x136   : > { %729 = vst [vmem:[#allocation2 + $0x50] sm:$0xff] %v679_v34  ;;  %737 = vst [vmem:[#allocation2 + $0x60] sm:$0xff] %v711_v35  ;;  %v690_v38 = vadd.f32 %v2162_v36, %v1890_v11  ;;  %v722_v39 = vadd.f32 %v2170_v37, %v1890_v11 }
 0x137   : > { %v681_v40 = vpop.f32.mrf.mxu0  ;;  %v713_v41 = vpop.f32.mrf.mxu1 }
 0x138   : > { %732 = vst [vmem:[#allocation2 + $0x48] sm:$0xff] %v690_v38  ;;  %740 = vst [vmem:[#allocation2 + $0x28] sm:$0xff] %v722_v39  ;;  %v682_v42 = vadd.f32 %v1890_v11, %v681_v40  ;;  %v714_v43 = vadd.f32 %v1890_v11, %v713_v41 }
 0x13a   : > { %730 = vst [vmem:[#allocation2 + $0x68] sm:$0xff] %v682_v42  ;;  %738 = vst [vmem:[#allocation2 + $0x70] sm:$0xff] %v714_v43 }
 0x13b PF: > { %v2350_v44 = vld [vmem:[%s2793_s14 + $0x74] ss:$8 sps:$4 sm:$0xff]   ;;  %v2352_v45 = vld [vmem:[%s2793_s14 + $0x70] ss:$8 sps:$4 sm:$0xff]   ;;  %v2586_v46 = vmov 0   ;;  %v2879_v62 = vld [vmem:[#allocation2] sm:$0xff]  ;;  %v812_v37 = vlaneseq }
 0x13c   : > { %934 = vmatprep.mubr.bf16.mxu0 %v2586_v46  ;;  %1027 = vmatprep.mubr.bf16.mxu1 %v2586_v46  ;;  %v2353_v47 = vld [vmem:[%s2793_s14 + $0x64] ss:$8 sps:$4 sm:$0xff]   ;;  %v2355_v48 = vld [vmem:[%s2793_s14 + $0x60] ss:$8 sps:$4 sm:$0xff]   ;;  %v2356_v49 = vld [vmem:[%s2793_s14 + $0x54] ss:$8 sps:$4 sm:$0xff]  }
 0x13d   : > { %902 = vmatprep.subr.bf16.mxu0 %v2350_v44  ;;  %995 = vmatprep.subr.bf16.mxu1 %v2350_v44  ;;  %v2358_v50 = vld [vmem:[%s2793_s14 + $0x50] ss:$8 sps:$4 sm:$0xff]   ;;  %v2359_v51 = vld [vmem:[%s2793_s14 + $0x44] ss:$8 sps:$4 sm:$0xff]   ;;  %v2361_v52 = vld [vmem:[%s2793_s14 + $0x40] ss:$8 sps:$4 sm:$0xff]  }
 0x13e   : > { %903 = vmatpush1.bf16.msra.mxu0 %v2352_v45  ;;  %996 = vmatpush1.bf16.msra.mxu1 %v2352_v45  ;;  %v2362_v53 = vld [vmem:[%s2793_s14 + $0x34] ss:$8 sps:$4 sm:$0xff]   ;;  %v2364_v54 = vld [vmem:[%s2793_s14 + $0x30] ss:$8 sps:$4 sm:$0xff]   ;;  %v2365_v55 = vld [vmem:[%s2793_s14 + $0x24] ss:$8 sps:$4 sm:$0xff]  }
 0x13f   : > { %904 = vmatprep.subr.bf16.mxu0 %v2353_v47  ;;  %997 = vmatprep.subr.bf16.mxu1 %v2353_v47  ;;  %v2367_v56 = vld [vmem:[%s2793_s14 + $0x20] ss:$8 sps:$4 sm:$0xff]   ;;  %v2368_v57 = vld [vmem:[%s2793_s14 + $0x14] ss:$8 sps:$4 sm:$0xff]   ;;  %v2370_v58 = vld [vmem:[%s2793_s14 + $0x10] ss:$8 sps:$4 sm:$0xff]  }
 0x140   : > { %v2371_v59 = vld [vmem:[%s2793_s14 + $0x4] ss:$8 sps:$4 sm:$0xff]   ;;  %v2373_v60 = vld [vmem:[%s2793_s14] ss:$8 sps:$4 sm:$0xff]   ;;  %v2877_v61 = vld [vmem:[#allocation2 + $0x30] sm:$0xff]  ;;  %v813_v38 = vshrl.u32 %v812_v37, 7 }
 0x141   : > { %v2881_v63 = vld [vmem:[#allocation2 + $0x40] sm:$0xff]  ;;  %v2374_v1 = vld [vmem:[%s2799_s11 + $0x78] sm:$0xff]   ;;  %v807_v2 = vpack.c.bf16 %v2879_v62, %v2877_v61  ;;  %v2376_v5 = vld [vmem:[%s2799_s11 + $0x70] sm:$0xff]   ;;  %p1943_p1 = scmp.ne.s32.totalorder %s2562_s23, 1 }
 0x142   : > { %905 = vmatpush1.bf16.msra.mxu0 %v2355_v48  ;;  %998 = vmatpush1.bf16.msra.mxu1 %v2355_v48  ;;  %v2883_v0 = vld [vmem:[#allocation2 + $0x20] sm:$0xff]  ;;  %v2375_v4 = vld [vmem:[%s2799_s11 + $0x38] sm:$0xff]   ;;  %v2898_v8 = vld [vmem:[#allocation2 + $0x10] sm:$0xff]  ;;  %v818_v39 = vsub.s32 1, %v813_v38  ;;  %v814_v40 = vsub.s32 0, %v813_v38  ;;  %s3220_s30 = sld [smem:[#allocation24_spill]] (!%p1943_p1) }
 0x143   : > { %906 = vmatprep.subr.bf16.mxu0 %v2356_v49  ;;  %999 = vmatprep.subr.bf16.mxu1 %v2356_v49  ;;  %v991_v3 = vpack.c.bf16 %v2883_v0, %v2881_v63  ;;  %v2892_v6 = vld [vmem:[#allocation2 + $0x58] sm:$0xff]  ;;  %v2377_v10 = vld [vmem:[%s2799_s11 + $0x30] sm:$0xff]   ;;  %v2378_v11 = vld [vmem:[%s2799_s11 + $0x68] sm:$0xff]   ;;  %s3221_s25 = sld [smem:[#allocation25_spill]] (!%p1943_p1) }
 0x144   : > { %v2896_v7 = vld [vmem:[#allocation2 + $0x18] sm:$0xff]  ;;  %v2379_v14 = vld [vmem:[%s2799_s11 + $0x28] sm:$0xff]   ;;  %v2380_v15 = vld [vmem:[%s2799_s11 + $0x60] sm:$0xff]  }
 0x145   : > { %v2900_v9 = vld [vmem:[#allocation2 + $0x38] sm:$0xff]  ;;  %v808_v12 = vpack.c.bf16 %v2896_v7, %v2892_v6  ;;  %v2910_v16 = vld [vmem:[#allocation2 + $0x50] sm:$0xff]  ;;  %v2914_v17 = vld [vmem:[#allocation2 + $0x68] sm:$0xff] }
 0x146   : > { %907 = vmatpush1.bf16.msra.mxu0 %v2358_v50  ;;  %1000 = vmatpush1.bf16.msra.mxu1 %v2358_v50  ;;  %v992_v13 = vpack.c.bf16 %v2900_v9, %v2898_v8  ;;  %v2916_v18 = vld [vmem:[#allocation2 + $0x60] sm:$0xff]  ;;  %v2918_v19 = vld [vmem:[#allocation2 + $0x70] sm:$0xff]  ;;  %v2382_v21 = vld [vmem:[%s2799_s11 + $0x58] sm:$0xff]   ;;  %v809_v22 = vpack.c.bf16 %v2914_v17, %v2910_v16 }
 0x147   : > { %908 = vmatprep.subr.bf16.mxu0 %v2359_v51  ;;  %1001 = vmatprep.subr.bf16.mxu1 %v2359_v51  ;;  %v2381_v20 = vld [vmem:[%s2799_s11 + $0x20] sm:$0xff]   ;;  %v993_v23 = vpack.c.bf16 %v2918_v19, %v2916_v18  ;;  %v2383_v24 = vld [vmem:[%s2799_s11 + $0x18] sm:$0xff]   ;;  %v2927_v25 = vld [vmem:[#allocation2 + $0x8] sm:$0xff] }
 0x148   : > { %v2931_v26 = vld [vmem:[#allocation2 + $0x48] sm:$0xff]  ;;  %v2933_v27 = vld [vmem:[#allocation2 + $0x78] sm:$0xff]  ;;  %v2384_v31 = vld [vmem:[%s2799_s11 + $0x50] sm:$0xff]  }
 0x149   : > { %v2935_v28 = vld [vmem:[#allocation2 + $0x28] sm:$0xff]  ;;  %v810_v29 = vpack.c.bf16 %v2931_v26, %v2927_v25  ;;  %v2385_v32 = vld [vmem:[%s2799_s11 + $0x10] sm:$0xff]   ;;  %v2388_v35 = vld [vmem:[%s2799_s11 + $0x40] sm:$0xff]  }
 0x14a   : > { %909 = vmatpush1.bf16.msra.mxu0 %v2361_v52  ;;  %1002 = vmatpush1.bf16.msra.mxu1 %v2361_v52  ;;  %v994_v30 = vpack.c.bf16 %v2935_v28, %v2933_v27  ;;  %v2386_v33 = vld [vmem:[%s2799_s11 + $0x48] sm:$0xff]   ;;  %v2389_v36 = vld [vmem:[%s2799_s11] sm:$0xff]  }
 0x14b   : > { %910 = vmatprep.subr.bf16.mxu0 %v2362_v53  ;;  %1003 = vmatprep.subr.bf16.mxu1 %v2362_v53  ;;  %v2387_v34 = vld [vmem:[%s2799_s11 + $0x8] sm:$0xff]   ;;  %v757_v41 = vld [vmem:[%s2822_s3] sm:$0x3] }
 0x14c   : > { %v2948_v44 = vrot.slane %v757_v41, %v818_v39  ;;  %v2950_v45 = vrot.slane %v757_v41, %v814_v40 }
 0x14e   : > { %911 = vmatpush1.bf16.msra.mxu0 %v2364_v54  ;;  %1004 = vmatpush1.bf16.msra.mxu1 %v2364_v54 }
 0x14f   : > { %912 = vmatprep.subr.bf16.mxu0 %v2365_v55  ;;  %1005 = vmatprep.subr.bf16.mxu1 %v2365_v55 }
 0x152   : > { %913 = vmatpush1.bf16.msra.mxu0 %v2367_v56  ;;  %1006 = vmatpush1.bf16.msra.mxu1 %v2367_v56 }
 0x153   : > { %914 = vmatprep.subr.bf16.mxu0 %v2368_v57  ;;  %1007 = vmatprep.subr.bf16.mxu1 %v2368_v57 }
 0x156   : > { %915 = vmatpush1.bf16.msra.mxu0 %v2370_v58  ;;  %1008 = vmatpush1.bf16.msra.mxu1 %v2370_v58 }
 0x157   : > { %916 = vmatprep.subr.bf16.mxu0 %v2371_v59  ;;  %1009 = vmatprep.subr.bf16.mxu1 %v2371_v59 }
 0x15a   : > { %917 = vmatpush1.bf16.msra.mxu0 %v2373_v60  ;;  %1010 = vmatpush1.bf16.msra.mxu1 %v2373_v60 }
 0x15b   : > { %2053 = vmatprep.subr.bf16.mxu0 %v2374_v1  ;;  %2093 = vmatprep.subr.bf16.mxu1 %v2374_v1 }
 0x15d   : > { %935 = vmatmul.mubr.bf16.vlgmr.msra.gmra.mxu0 %v807_v2  ;;  %1028 = vmatmul.mubr.bf16.vlgmr.msra.gmra.mxu1 %v991_v3 }
 0x15e   : > { %944 = vmatprep.mubr.bf16.mxu0 %v2586_v46  ;;  %1037 = vmatprep.mubr.bf16.mxu1 %v2586_v46 }
 0x15f   : > { %2054 = vmatpush3.bf16.msra.mxu0 %v2375_v4  ;;  %2094 = vmatpush3.bf16.msra.mxu1 %v2375_v4 }
 0x160   : > { %2055 = vmatprep.subr.bf16.mxu0 %v2376_v5  ;;  %2095 = vmatprep.subr.bf16.mxu1 %v2376_v5 }
 0x163   : > { %2056 = vmatpush3.bf16.msra.mxu0 %v2377_v10  ;;  %2096 = vmatpush3.bf16.msra.mxu1 %v2377_v10 }
 0x164   : > { %2057 = vmatprep.subr.bf16.mxu0 %v2378_v11  ;;  %2097 = vmatprep.subr.bf16.mxu1 %v2378_v11 }
 0x165   : > { %945 = vmatmul.mubr.bf16.gmra.mxu0 %v808_v12  ;;  %1038 = vmatmul.mubr.bf16.gmra.mxu1 %v992_v13 }
 0x166   : > { %954 = vmatprep.mubr.bf16.mxu0 %v2586_v46  ;;  %1047 = vmatprep.mubr.bf16.mxu1 %v2586_v46 }
 0x167   : > { %2058 = vmatpush3.bf16.msra.mxu0 %v2379_v14  ;;  %2098 = vmatpush3.bf16.msra.mxu1 %v2379_v14 }
 0x168   : > { %2059 = vmatprep.subr.bf16.mxu0 %v2380_v15  ;;  %2099 = vmatprep.subr.bf16.mxu1 %v2380_v15 }
 0x16b   : > { %2060 = vmatpush3.bf16.msra.mxu0 %v2381_v20  ;;  %2100 = vmatpush3.bf16.msra.mxu1 %v2381_v20 }
 0x16c   : > { %2061 = vmatprep.subr.bf16.mxu0 %v2382_v21  ;;  %2101 = vmatprep.subr.bf16.mxu1 %v2382_v21 }
 0x16d   : > { %955 = vmatmul.mubr.bf16.gmra.mxu0 %v809_v22  ;;  %1048 = vmatmul.mubr.bf16.gmra.mxu1 %v993_v23 }
 0x16e   : > { %964 = vmatprep.mubr.bf16.mxu0 %v2586_v46  ;;  %1057 = vmatprep.mubr.bf16.mxu1 %v2586_v46 }
 0x16f   : > { %2062 = vmatpush3.bf16.msra.mxu0 %v2383_v24  ;;  %2102 = vmatpush3.bf16.msra.mxu1 %v2383_v24 }
 0x170   : > { %2063 = vmatprep.subr.bf16.mxu0 %v2384_v31  ;;  %2103 = vmatprep.subr.bf16.mxu1 %v2384_v31 }
 0x173   : > { %2064 = vmatpush3.bf16.msra.mxu0 %v2385_v32  ;;  %2104 = vmatpush3.bf16.msra.mxu1 %v2385_v32 }
 0x174   : > { %2065 = vmatprep.subr.bf16.mxu0 %v2386_v33  ;;  %2105 = vmatprep.subr.bf16.mxu1 %v2386_v33 }
 0x175   : > { %965 = vmatmul.mubr.bf16.gmra.mxu0 %v810_v29  ;;  %1058 = vmatmul.mubr.bf16.gmra.mxu1 %v994_v30 }
 0x177   : > { %2066 = vmatpush3.bf16.msra.mxu0 %v2387_v34  ;;  %2106 = vmatpush3.bf16.msra.mxu1 %v2387_v34 }
 0x178   : > { %2067 = vmatprep.subr.bf16.mxu0 %v2388_v35  ;;  %2107 = vmatprep.subr.bf16.mxu1 %v2388_v35 }
 0x17b   : > { %2068 = vmatpush3.bf16.msra.mxu0 %v2389_v36  ;;  %2108 = vmatpush3.bf16.msra.mxu1 %v2389_v36 }
 0x21d   : > { %v936_v42 = vpop.f32.mrf.mxu0  ;;  %v1029_v43 = vpop.f32.mrf.mxu1 }
 0x21e   : > { %v937_v54 = vadd.f32 %v936_v42, %v2950_v45  ;;  %v1030_v55 = vadd.f32 %v1029_v43, %v2950_v45 }
 0x21f   : > { %v938_v46 = vpop.f32.mrf.mxu0  ;;  %v1031_v47 = vpop.f32.mrf.mxu1 }
 0x220   : > { %v939_v50 = vadd.f32 %v938_v46, %v2948_v44  ;;  %v1032_v51 = vadd.f32 %v1031_v47, %v2948_v44  ;;  %v975_v12 = vmax.f32 %v937_v54, 0.0  ;;  %v1068_v13 = vmax.f32 %v1030_v55, 0.0 }
 0x221   : > { %v940_v48 = vpop.f32.mrf.mxu0  ;;  %v1033_v49 = vpop.f32.mrf.mxu1 }
 0x222   : > { %v941_v52 = vadd.f32 %v940_v48, %v2950_v45  ;;  %v1034_v53 = vadd.f32 %v1033_v49, %v2950_v45  ;;  %v976_v4 = vmax.f32 %v939_v50, 0.0  ;;  %v1069_v5 = vmax.f32 %v1032_v51, 0.0 }
 0x223   : > { %v942_v56 = vpop.f32.mrf.mxu0  ;;  %v1035_v57 = vpop.f32.mrf.mxu1 }
 0x224   : > { %v943_v58 = vadd.f32 %v942_v56, %v2948_v44  ;;  %v1036_v59 = vadd.f32 %v1035_v57, %v2948_v44  ;;  %v977_v60 = vmax.f32 %v941_v52, 0.0  ;;  %v1070_v1 = vmax.f32 %v1034_v53, 0.0 }
 0x225   : > { %v946_v2 = vpop.f32.mrf.mxu0  ;;  %v1039_v3 = vpop.f32.mrf.mxu1 }
 0x226   : > { %v978_v10 = vmax.f32 %v943_v58, 0.0  ;;  %v1071_v11 = vmax.f32 %v1036_v59, 0.0  ;;  %v1084_v22 = vpack.c.bf16 %v977_v60, %v975_v12  ;;  %v1283_v23 = vpack.c.bf16 %v1070_v1, %v1068_v13 }
 0x227   : > { %v948_v14 = vpop.f32.mrf.mxu0  ;;  %v1041_v15 = vpop.f32.mrf.mxu1  ;;  %v947_v34 = vadd.f32 %v946_v2, %v2950_v45  ;;  %v1040_v35 = vadd.f32 %v1039_v3, %v2950_v45 }
 0x228   : > { %v1085_v20 = vpack.c.bf16 %v978_v10, %v976_v4  ;;  %v1284_v21 = vpack.c.bf16 %v1071_v11, %v1069_v5  ;;  %v949_v24 = vadd.f32 %v948_v14, %v2948_v44  ;;  %v1042_v31 = vadd.f32 %v1041_v15, %v2948_v44 }
 0x229   : > { %v950_v29 = vpop.f32.mrf.mxu0  ;;  %v1043_v30 = vpop.f32.mrf.mxu1  ;;  %v979_v50 = vmax.f32 %v947_v34, 0.0  ;;  %v1072_v51 = vmax.f32 %v1040_v35, 0.0 }
 0x22a   : > { %v951_v32 = vadd.f32 %v950_v29, %v2950_v45  ;;  %v1044_v33 = vadd.f32 %v1043_v30, %v2950_v45  ;;  %1220 = vmatprep.mubr.bf16.mxu0 %v1085_v20  ;;  %1323 = vmatprep.mubr.bf16.mxu1 %v1284_v21  ;;  %v980_v46 = vmax.f32 %v949_v24, 0.0  ;;  %v1073_v47 = vmax.f32 %v1042_v31, 0.0 }
 0x22b   : > { %v952_v36 = vpop.f32.mrf.mxu0  ;;  %v1045_v37 = vpop.f32.mrf.mxu1  ;;  %1221 = vmatmul.mubr.bf16.vlgmr.msra.gmra.mxu0 %v1084_v22  ;;  %1324 = vmatmul.mubr.bf16.vlgmr.msra.gmra.mxu1 %v1283_v23 }
 0x22c   : > { %v953_v38 = vadd.f32 %v952_v36, %v2948_v44  ;;  %v1046_v39 = vadd.f32 %v1045_v37, %v2948_v44  ;;  %v981_v40 = vmax.f32 %v951_v32, 0.0  ;;  %v1074_v41 = vmax.f32 %v1044_v33, 0.0 }
 0x22d   : > { %v956_v42 = vpop.f32.mrf.mxu0  ;;  %v1049_v43 = vpop.f32.mrf.mxu1 }
 0x22e   : > { %v982_v48 = vmax.f32 %v953_v38, 0.0  ;;  %v1075_v49 = vmax.f32 %v1046_v39, 0.0  ;;  %v1086_v56 = vpack.c.bf16 %v981_v40, %v979_v50  ;;  %v1285_v57 = vpack.c.bf16 %v1074_v41, %v1072_v51 }
 0x22f   : > { %v958_v52 = vpop.f32.mrf.mxu0  ;;  %v1051_v53 = vpop.f32.mrf.mxu1  ;;  %v957_v4 = vadd.f32 %v956_v42, %v2950_v45  ;;  %v1050_v5 = vadd.f32 %v1049_v43, %v2950_v45 }
 0x230   : > { %v1087_v54 = vpack.c.bf16 %v982_v48, %v980_v46  ;;  %v1286_v55 = vpack.c.bf16 %v1075_v49, %v1073_v47  ;;  %v959_v58 = vadd.f32 %v958_v52, %v2948_v44  ;;  %v1052_v1 = vadd.f32 %v1051_v53, %v2948_v44 }
 0x231   : > { %v960_v59 = vpop.f32.mrf.mxu0  ;;  %v1053_v60 = vpop.f32.mrf.mxu1  ;;  %v983_v30 = vmax.f32 %v957_v4, 0.0  ;;  %v1076_v31 = vmax.f32 %v1050_v5, 0.0 }
 0x232   : > { %v961_v2 = vadd.f32 %v960_v59, %v2950_v45  ;;  %v1054_v3 = vadd.f32 %v1053_v60, %v2950_v45  ;;  %1228 = vmatprep.mubr.bf16.mxu0 %v1087_v54  ;;  %1331 = vmatprep.mubr.bf16.mxu1 %v1286_v55  ;;  %v984_v22 = vmax.f32 %v959_v58, 0.0  ;;  %v1077_v23 = vmax.f32 %v1052_v1, 0.0 }
 0x233   : > { %v962_v10 = vpop.f32.mrf.mxu0  ;;  %v1055_v11 = vpop.f32.mrf.mxu1  ;;  %1229 = vmatmul.mubr.bf16.gmra.mxu0 %v1086_v56  ;;  %1332 = vmatmul.mubr.bf16.gmra.mxu1 %v1285_v57 }
 0x234   : > { %v963_v12 = vadd.f32 %v962_v10, %v2948_v44  ;;  %v1056_v13 = vadd.f32 %v1055_v11, %v2948_v44  ;;  %v985_v14 = vmax.f32 %v961_v2, 0.0  ;;  %v1078_v15 = vmax.f32 %v1054_v3, 0.0 }
 0x235   : > { %v966_v20 = vpop.f32.mrf.mxu0  ;;  %v1059_v21 = vpop.f32.mrf.mxu1 }
 0x236   : > { %v986_v24 = vmax.f32 %v963_v12, 0.0  ;;  %v1079_v29 = vmax.f32 %v1056_v13, 0.0  ;;  %v1088_v36 = vpack.c.bf16 %v985_v14, %v983_v30  ;;  %v1287_v37 = vpack.c.bf16 %v1078_v15, %v1076_v31  ;;  %v2989_v12 = vld [vmem:[%s509_s28] ss:$0 sm:$0xff] }
 0x237   : > { %v968_v32 = vpop.f32.mrf.mxu0  ;;  %v1061_v33 = vpop.f32.mrf.mxu1  ;;  %v967_v46 = vadd.f32 %v966_v20, %v2950_v45  ;;  %v1060_v47 = vadd.f32 %v1059_v21, %v2950_v45 }
 0x238   : > { %v1089_v34 = vpack.c.bf16 %v986_v24, %v984_v22  ;;  %v1288_v35 = vpack.c.bf16 %v1079_v29, %v1077_v23  ;;  %v969_v38 = vadd.f32 %v968_v32, %v2948_v44  ;;  %v1062_v41 = vadd.f32 %v1061_v33, %v2948_v44 }
 0x239   : > { %v970_v39 = vpop.f32.mrf.mxu0  ;;  %v1063_v40 = vpop.f32.mrf.mxu1  ;;  %v987_v58 = vmax.f32 %v967_v46, 0.0  ;;  %v1080_v59 = vmax.f32 %v1060_v47, 0.0 }
 0x23a   : > { %v971_v42 = vadd.f32 %v970_v39, %v2950_v45  ;;  %v1064_v43 = vadd.f32 %v1063_v40, %v2950_v45  ;;  %1236 = vmatprep.mubr.bf16.mxu0 %v1089_v34  ;;  %1339 = vmatprep.mubr.bf16.mxu1 %v1288_v35  ;;  %v988_v54 = vmax.f32 %v969_v38, 0.0  ;;  %v1081_v55 = vmax.f32 %v1062_v41, 0.0 }
 0x23b   : > { %v972_v48 = vpop.f32.mrf.mxu0  ;;  %v1065_v49 = vpop.f32.mrf.mxu1  ;;  %1237 = vmatmul.mubr.bf16.gmra.mxu0 %v1088_v36  ;;  %1340 = vmatmul.mubr.bf16.gmra.mxu1 %v1287_v37 }
 0x23c   : > { %v973_v50 = vadd.f32 %v972_v48, %v2948_v44  ;;  %v1066_v51 = vadd.f32 %v1065_v49, %v2948_v44  ;;  %v989_v52 = vmax.f32 %v971_v42, 0.0  ;;  %v1082_v53 = vmax.f32 %v1064_v43, 0.0 }
 0x23e   : > { %v990_v56 = vmax.f32 %v973_v50, 0.0  ;;  %v1083_v57 = vmax.f32 %v1066_v51, 0.0  ;;  %v1090_v45 = vpack.c.bf16 %v989_v52, %v987_v58  ;;  %v1289_v2 = vpack.c.bf16 %v1082_v53, %v1080_v59 }
 0x240   : > { %v1091_v60 = vpack.c.bf16 %v990_v56, %v988_v54  ;;  %v1290_v1 = vpack.c.bf16 %v1083_v57, %v1081_v55 }
 0x242   : > { %1244 = vmatprep.mubr.bf16.mxu0 %v1091_v60  ;;  %1347 = vmatprep.mubr.bf16.mxu1 %v1290_v1 }
 0x243   : > { %1245 = vmatmul.mubr.bf16.gmra.mxu0 %v1090_v45  ;;  %1348 = vmatmul.mubr.bf16.gmra.mxu1 %v1289_v2 }
 0x2eb   : > { %v2069_v3 = vpop.f32.mrf.mxu0  ;;  %v2109_v4 = vpop.f32.mrf.mxu1 }
 0x2ed   : > { %v2070_v44 = vpop.f32.mrf.mxu0  ;;  %v2110_v5 = vpop.f32.mrf.mxu1 }
 0x2ee   : > { %v2071_v10 = vadd.f32 %v2070_v44, %v2069_v3  ;;  %v2111_v11 = vadd.f32 %v2110_v5, %v2109_v4 }
 0x2ef   : > { %v2072_v13 = vpop.f32.mrf.mxu0  ;;  %v2112_v14 = vpop.f32.mrf.mxu1 }
 0x2f0   : > { %v1253_v15 = vadd.f32 %v2071_v10, %v2877_v61  ;;  %v1356_v20 = vadd.f32 %v2111_v11, %v2881_v63 }
 0x2f1   : > { %v2073_v21 = vpop.f32.mrf.mxu0  ;;  %v2113_v22 = vpop.f32.mrf.mxu1 }
 0x2f2   : > { %v1267_v23 = vadd.f32 %v2989_v12, %v1253_v15  ;;  %v1364_v24 = vadd.f32 %v2989_v12, %v1356_v20  ;;  %v2074_v29 = vadd.f32 %v2073_v21, %v2072_v13  ;;  %v2114_v30 = vadd.f32 %v2113_v22, %v2112_v14 }
 0x2f3   : > { %v2075_v31 = vpop.f32.mrf.mxu0  ;;  %v2115_v32 = vpop.f32.mrf.mxu1 }
 0x2f4   : > { %1275 = vst [vmem:[#allocation2 + $0x30] sm:$0xff] %v1267_v23  ;;  %1372 = vst [vmem:[#allocation2 + $0x40] sm:$0xff] %v1364_v24  ;;  %v1254_v33 = vadd.f32 %v2074_v29, %v2879_v62  ;;  %v1357_v34 = vadd.f32 %v2114_v30, %v2883_v0 }
 0x2f5   : > { %v2076_v35 = vpop.f32.mrf.mxu0  ;;  %v2116_v61 = vpop.f32.mrf.mxu1 }
 0x2f6   : > { %v1268_v63 = vadd.f32 %v2989_v12, %v1254_v33  ;;  %v1365_v36 = vadd.f32 %v2989_v12, %v1357_v34  ;;  %v2077_v37 = vadd.f32 %v2076_v35, %v2075_v31  ;;  %v2117_v38 = vadd.f32 %v2116_v61, %v2115_v32 }
 0x2f7   : > { %v2078_v39 = vpop.f32.mrf.mxu0  ;;  %v2118_v40 = vpop.f32.mrf.mxu1 }
 0x2f8   : > { %1276 = vst [vmem:[#allocation2] sm:$0xff] %v1268_v63  ;;  %1373 = vst [vmem:[#allocation2 + $0x20] sm:$0xff] %v1365_v36  ;;  %v1255_v41 = vadd.f32 %v2077_v37, %v2892_v6  ;;  %v1358_v42 = vadd.f32 %v2117_v38, %v2898_v8 }
 0x2f9   : > { %v2079_v43 = vpop.f32.mrf.mxu0  ;;  %v2119_v62 = vpop.f32.mrf.mxu1 }
 0x2fa   : > { %v1269_v0 = vadd.f32 %v2989_v12, %v1255_v41  ;;  %v1366_v46 = vadd.f32 %v2989_v12, %v1358_v42  ;;  %v2080_v47 = vadd.f32 %v2079_v43, %v2078_v39  ;;  %v2120_v48 = vadd.f32 %v2119_v62, %v2118_v40 }
 0x2fb   : > { %v2081_v49 = vpop.f32.mrf.mxu0  ;;  %v2121_v50 = vpop.f32.mrf.mxu1 }
 0x2fc   : > { %1277 = vst [vmem:[#allocation2 + $0x58] sm:$0xff] %v1269_v0  ;;  %1374 = vst [vmem:[#allocation2 + $0x10] sm:$0xff] %v1366_v46  ;;  %v1256_v51 = vadd.f32 %v2080_v47, %v2896_v7  ;;  %v1359_v52 = vadd.f32 %v2120_v48, %v2900_v9 }
 0x2fd   : > { %v2082_v53 = vpop.f32.mrf.mxu0  ;;  %v2122_v6 = vpop.f32.mrf.mxu1 }
 0x2fe   : > { %v1270_v8 = vadd.f32 %v2989_v12, %v1256_v51  ;;  %v1367_v54 = vadd.f32 %v2989_v12, %v1359_v52  ;;  %v2083_v55 = vadd.f32 %v2082_v53, %v2081_v49  ;;  %v2123_v56 = vadd.f32 %v2122_v6, %v2121_v50 }
 0x2ff   : > { %v2084_v57 = vpop.f32.mrf.mxu0  ;;  %v2124_v58 = vpop.f32.mrf.mxu1 }
 0x300   : > { %1278 = vst [vmem:[#allocation2 + $0x18] sm:$0xff] %v1270_v8  ;;  %1375 = vst [vmem:[#allocation2 + $0x38] sm:$0xff] %v1367_v54  ;;  %v1257_v59 = vadd.f32 %v2083_v55, %v2910_v16  ;;  %v1360_v60 = vadd.f32 %v2123_v56, %v2916_v18 }
 0x301   : > { %v2085_v1 = vpop.f32.mrf.mxu0  ;;  %v2125_v7 = vpop.f32.mrf.mxu1 }
 0x302   : > { %v1271_v9 = vadd.f32 %v2989_v12, %v1257_v59  ;;  %v1368_v45 = vadd.f32 %v2989_v12, %v1360_v60  ;;  %v2086_v2 = vadd.f32 %v2085_v1, %v2084_v57  ;;  %v2126_v3 = vadd.f32 %v2125_v7, %v2124_v58 }
 0x303   : > { %v2087_v4 = vpop.f32.mrf.mxu0  ;;  %v2127_v44 = vpop.f32.mrf.mxu1 }
 0x304   : > { %1279 = vst [vmem:[#allocation2 + $0x50] sm:$0xff] %v1271_v9  ;;  %1376 = vst [vmem:[#allocation2 + $0x60] sm:$0xff] %v1368_v45  ;;  %v1258_v5 = vadd.f32 %v2086_v2, %v2914_v17  ;;  %v1361_v10 = vadd.f32 %v2126_v3, %v2918_v19 }
 0x305   : > { %v2088_v11 = vpop.f32.mrf.mxu0  ;;  %v2128_v16 = vpop.f32.mrf.mxu1 }
 0x306   : > { %v1272_v18 = vadd.f32 %v2989_v12, %v1258_v5  ;;  %v1369_v13 = vadd.f32 %v2989_v12, %v1361_v10  ;;  %v2089_v14 = vadd.f32 %v2088_v11, %v2087_v4  ;;  %v2129_v15 = vadd.f32 %v2128_v16, %v2127_v44 }
 0x307   : > { %v2090_v20 = vpop.f32.mrf.mxu0  ;;  %v2130_v21 = vpop.f32.mrf.mxu1 }
 0x308   : > { %1280 = vst [vmem:[#allocation2 + $0x68] sm:$0xff] %v1272_v18  ;;  %1377 = vst [vmem:[#allocation2 + $0x70] sm:$0xff] %v1369_v13  ;;  %v1259_v22 = vadd.f32 %v2089_v14, %v2927_v25  ;;  %v1362_v23 = vadd.f32 %v2129_v15, %v2933_v27 }
 0x309   : > { %v2091_v24 = vpop.f32.mrf.mxu0  ;;  %v2131_v17 = vpop.f32.mrf.mxu1 }
 0x30a   : > { %v1273_v19 = vadd.f32 %v2989_v12, %v1259_v22  ;;  %v1370_v29 = vadd.f32 %v2989_v12, %v1362_v23  ;;  %v2092_v30 = vadd.f32 %v2091_v24, %v2090_v20  ;;  %v2132_v31 = vadd.f32 %v2131_v17, %v2130_v21 }
 0x30c   : > { %1281 = vst [vmem:[#allocation2 + $0x8] sm:$0xff] %v1273_v19  ;;  %1378 = vst [vmem:[#allocation2 + $0x78] sm:$0xff] %v1370_v29  ;;  %v1260_v32 = vadd.f32 %v2092_v30, %v2931_v26  ;;  %v1363_v33 = vadd.f32 %v2132_v31, %v2935_v28  ;;  %1383 = sbr.rel (%p1943_p1) target bundleno = 1030 (0x406), region = 80 }
 0x30e   : > { %v1274_v34 = vadd.f32 %v2989_v12, %v1260_v32  ;;  %v1371_v25 = vadd.f32 %v2989_v12, %v1363_v33 }
 0x310   : > { %1282 = vst [vmem:[#allocation2 + $0x48] sm:$0xff] %v1274_v34  ;;  %1379 = vst [vmem:[#allocation2 + $0x28] sm:$0xff] %v1371_v25 }
 0x311   : > { %v2390_v27 = vld [vmem:[%s3181_s9 + $0x38] sm:$0xff]   ;;  %v2391_v35 = vld [vmem:[%s3181_s9 + $0x30] sm:$0xff]   ;;  %v2392_v26 = vld [vmem:[%s3181_s9 + $0x28] sm:$0xff]  }
 0x312   : > { %2171 = vmatprep.subr.bf16.mxu0 %v2390_v27  ;;  %2209 = vmatprep.subr.bf16.mxu1 %v2390_v27  ;;  %v2393_v28 = vld [vmem:[%s3181_s9 + $0x20] sm:$0xff]   ;;  %v1384_v12 = vld [vmem:[#allocation2 + $0x30] sm:$0xff]  ;;  %v2394_v0 = vld [vmem:[%s3181_s9 + $0x18] sm:$0xff]  }
 0x313   : > { %2172 = vmatpush3.bf16.msra.mxu0 %v2390_v27  ;;  %2217 = vmatpush3.bf16.msra.mxu1 %v2390_v27  ;;  %v1385_v61 = vld [vmem:[#allocation2] sm:$0xff]  ;;  %v1386_v50 = vld [vmem:[#allocation2 + $0x58] sm:$0xff]  ;;  %v1394_v6 = vld [vmem:[#allocation2 + $0x10] sm:$0xff] }
 0x314   : > { %2173 = vmatprep.subr.bf16.mxu0 %v2391_v35  ;;  %2210 = vmatprep.subr.bf16.mxu1 %v2391_v35  ;;  %v3039_v63 = vld [vmem:[%s3179_s7] ss:$0 sm:$0xff]  ;;  %v1387_v53 = vld [vmem:[#allocation2 + $0x18] sm:$0xff]  ;;  %v2395_v54 = vld [vmem:[%s3181_s9 + $0x10] sm:$0xff]  }
 0x315   : > { %v1407_v36 = vmul.f32 %v3039_v63, %v1384_v12  ;;  %v1408_v37 = vmul.f32 %v3039_v63, %v1385_v61  ;;  %v3046_v38 = vld [vmem:[%s3220_s30] ss:$0 sm:$0xff]  ;;  %v1395_v8 = vld [vmem:[#allocation2 + $0x38] sm:$0xff]  ;;  %v1388_v56 = vld [vmem:[#allocation2 + $0x50] sm:$0xff]  ;;  %v1409_v1 = vmul.f32 %v3039_v63, %v1386_v50  ;;  %v1410_v7 = vmul.f32 %v3039_v63, %v1387_v53 }
 0x316   : > { %v1392_v39 = vld [vmem:[#allocation2 + $0x40] sm:$0xff]  ;;  %v1389_v58 = vld [vmem:[#allocation2 + $0x68] sm:$0xff]  ;;  %v1397_v60 = vld [vmem:[#allocation2 + $0x70] sm:$0xff]  ;;  %v1417_v9 = vmul.f32 %v3039_v63, %v1394_v6  ;;  %v1418_v45 = vmul.f32 %v3039_v63, %v1395_v8  ;;  %v1411_v2 = vmul.f32 %v3039_v63, %v1388_v56 }
 0x317   : > { %2174 = vmatpush3.bf16.msra.mxu0 %v2391_v35  ;;  %2218 = vmatpush3.bf16.msra.mxu1 %v2391_v35  ;;  %v1393_v40 = vld [vmem:[#allocation2 + $0x20] sm:$0xff]  ;;  %v1415_v41 = vmul.f32 %v3039_v63, %v1392_v39  ;;  %v1430_v43 = vadd.f32 %v3046_v38, %v1407_v36  ;;  %v1431_v62 = vadd.f32 %v3046_v38, %v1408_v37  ;;  %v2396_v5 = vld [vmem:[%s3181_s9 + $0x8] sm:$0xff]   ;;  %v1398_v23 = vld [vmem:[#allocation2 + $0x78] sm:$0xff] }
 0x318   : > { %2175 = vmatprep.subr.bf16.mxu0 %v2392_v26  ;;  %2211 = vmatprep.subr.bf16.mxu1 %v2392_v26  ;;  %v1416_v42 = vmul.f32 %v3039_v63, %v1393_v40  ;;  %v1396_v59 = vld [vmem:[#allocation2 + $0x60] sm:$0xff]  ;;  %v1412_v3 = vmul.f32 %v3039_v63, %v1389_v58  ;;  %v1420_v44 = vmul.f32 %v3039_v63, %v1397_v60  ;;  %v1390_v14 = vld [vmem:[#allocation2 + $0x8] sm:$0xff] }
 0x319   : > { %v1438_v46 = vadd.f32 %v3046_v38, %v1415_v41  ;;  %v1446_v48 = vmax.f32 %v1430_v43, 0.0  ;;  %v1447_v49 = vmax.f32 %v1431_v62, 0.0  ;;  %v1419_v4 = vmul.f32 %v3039_v63, %v1396_v59  ;;  %v1391_v22 = vld [vmem:[#allocation2 + $0x48] sm:$0xff]  ;;  %v2397_v17 = vld [vmem:[%s3181_s9] sm:$0xff]  }
 0x31a   : > { %v1439_v47 = vadd.f32 %v3046_v38, %v1416_v42  ;;  %v1432_v10 = vadd.f32 %v3046_v38, %v1409_v1  ;;  %v1433_v11 = vadd.f32 %v3046_v38, %v1410_v7  ;;  %v1440_v16 = vadd.f32 %v3046_v38, %v1417_v9  ;;  %v1399_v24 = vld [vmem:[#allocation2 + $0x28] sm:$0xff] }
 0x31b   : > { %2176 = vmatpush3.bf16.msra.mxu0 %v2392_v26  ;;  %2219 = vmatpush3.bf16.msra.mxu1 %v2392_v26  ;;  %v1454_v51 = vmax.f32 %v1438_v46, 0.0  ;;  %v1462_v55 = vpack.c.bf16 %v1447_v49, %v1446_v48  ;;  %v1441_v18 = vadd.f32 %v3046_v38, %v1418_v45  ;;  %v1434_v13 = vadd.f32 %v3046_v38, %v1411_v2 }
 0x31c   : > { %2177 = vmatprep.subr.bf16.mxu0 %v2393_v28  ;;  %2212 = vmatprep.subr.bf16.mxu1 %v2393_v28  ;;  %v1455_v52 = vmax.f32 %v1439_v47, 0.0  ;;  %v1435_v15 = vadd.f32 %v3046_v38, %v1412_v3  ;;  %v1442_v20 = vadd.f32 %v3046_v38, %v1419_v4  ;;  %v1443_v21 = vadd.f32 %v3046_v38, %v1420_v44 }
 0x31d   : > { %2187 = vmatprep.mubr.bf16.mxu0 %v1462_v55  ;;  %v1448_v19 = vmax.f32 %v1432_v10, 0.0  ;;  %v1449_v29 = vmax.f32 %v1433_v11, 0.0  ;;  %v1456_v30 = vmax.f32 %v1440_v16, 0.0  ;;  %v1457_v31 = vmax.f32 %v1441_v18, 0.0 }
 0x31e   : > { %v1466_v57 = vpack.c.bf16 %v1455_v52, %v1454_v51  ;;  %v1413_v32 = vmul.f32 %v3039_v63, %v1390_v14  ;;  %v1414_v33 = vmul.f32 %v3039_v63, %v1391_v22  ;;  %v1421_v34 = vmul.f32 %v3039_v63, %v1398_v23 }
 0x31f   : > { %2178 = vmatpush3.bf16.msra.mxu0 %v2393_v28  ;;  %2220 = vmatpush3.bf16.msra.mxu1 %v2393_v28  ;;  %v1422_v25 = vmul.f32 %v3039_v63, %v1399_v24  ;;  %v1450_v27 = vmax.f32 %v1434_v13, 0.0  ;;  %v1451_v35 = vmax.f32 %v1435_v15, 0.0  ;;  %v1458_v26 = vmax.f32 %v1442_v20, 0.0 }
 0x320   : > { %2179 = vmatprep.subr.bf16.mxu0 %v2394_v0  ;;  %2213 = vmatprep.subr.bf16.mxu1 %v2394_v0  ;;  %v1459_v28 = vmax.f32 %v1443_v21, 0.0  ;;  %v1463_v12 = vpack.c.bf16 %v1449_v29, %v1448_v19  ;;  %v1467_v61 = vpack.c.bf16 %v1457_v31, %v1456_v30  ;;  %v1436_v36 = vadd.f32 %v3046_v38, %v1413_v32 }
 0x321   : > { %2195 = vmatprep.mubr.bf16.mxu1 %v1466_v57  ;;  %v1437_v37 = vadd.f32 %v3046_v38, %v1414_v33  ;;  %v1444_v39 = vadd.f32 %v3046_v38, %v1421_v34  ;;  %v1445_v40 = vadd.f32 %v3046_v38, %v1422_v25  ;;  %v1464_v63 = vpack.c.bf16 %v1451_v35, %v1450_v27  ;;  %v1946_v38 = vld [vmem:[%s3221_s25] ss:$0 sm:$0xff] }
 0x322   : > { %v1468_v41 = vpack.c.bf16 %v1459_v28, %v1458_v26  ;;  %v1452_v42 = vmax.f32 %v1436_v36, 0.0 }
 0x323   : > { %2180 = vmatpush3.bf16.msra.mxu0 %v2394_v0  ;;  %2221 = vmatpush3.bf16.msra.mxu1 %v2394_v0  ;;  %v1453_v43 = vmax.f32 %v1437_v37, 0.0  ;;  %v1460_v62 = vmax.f32 %v1444_v39, 0.0  ;;  %v1461_v0 = vmax.f32 %v1445_v40, 0.0 }
 0x324   : > { %2181 = vmatprep.subr.bf16.mxu0 %v2395_v54  ;;  %2214 = vmatprep.subr.bf16.mxu1 %v2395_v54 }
 0x325   : > { %v1465_v46 = vpack.c.bf16 %v1453_v43, %v1452_v42  ;;  %v1469_v47 = vpack.c.bf16 %v1461_v0, %v1460_v62 }
 0x327   : > { %2182 = vmatpush3.bf16.msra.mxu0 %v2395_v54  ;;  %2222 = vmatpush3.bf16.msra.mxu1 %v2395_v54 }
 0x328   : > { %2183 = vmatprep.subr.bf16.mxu0 %v2396_v5  ;;  %2215 = vmatprep.subr.bf16.mxu1 %v2396_v5 }
 0x32b   : > { %2184 = vmatpush3.bf16.msra.mxu0 %v2396_v5  ;;  %2223 = vmatpush3.bf16.msra.mxu1 %v2396_v5 }
 0x32c   : > { %2185 = vmatprep.subr.bf16.mxu0 %v2397_v17  ;;  %2216 = vmatprep.subr.bf16.mxu1 %v2397_v17 }
 0x32f   : > { %2186 = vmatpush3.bf16.msra.mxu0 %v2397_v17  ;;  %2224 = vmatpush3.bf16.msra.mxu1 %v2397_v17 }
 0x332   : > { %2188 = vmatmul.mubr.bf16.vlgmr.msra.gmra.mxu0 %v1463_v12  ;;  %2196 = vmatmul.mubr.bf16.vlgmr.msra.gmra.mxu1 %v1467_v61 }
 0x333   : > { %2191 = vmatprep.mubr.bf16.mxu0 %v1464_v63  ;;  %2199 = vmatprep.mubr.bf16.mxu1 %v1468_v41 }
 0x33a   : > { %2192 = vmatmul.mubr.bf16.gmra.mxu0 %v1465_v46  ;;  %2200 = vmatmul.mubr.bf16.gmra.mxu1 %v1469_v47 }
 0x3f2   : > { %v2189_v48 = vpop.f32.mrf.mxu0  ;;  %v2197_v49 = vpop.f32.mrf.mxu1 }
 0x3f3   : > { %v1584_v6 = vadd.f32 %v2189_v48, %v1946_v38  ;;  %v1616_v8 = vadd.f32 %v2197_v49, %v1946_v38 }
 0x3f4   : > { %v1575_v50 = vpop.f32.mrf.mxu0  ;;  %v1607_v51 = vpop.f32.mrf.mxu1 }
 0x3f5   : > { %v1576_v56 = vadd.f32 %v1946_v38, %v1575_v50  ;;  %v1608_v57 = vadd.f32 %v1946_v38, %v1607_v51 }
 0x3f6   : > { %v2190_v52 = vpop.f32.mrf.mxu0  ;;  %v2198_v53 = vpop.f32.mrf.mxu1 }
 0x3f7   : > { %v1587_v54 = vadd.f32 %v2190_v52, %v1946_v38  ;;  %v1619_v55 = vadd.f32 %v2198_v53, %v1946_v38 }
 0x3f8   : > { %v1578_v58 = vpop.f32.mrf.mxu0  ;;  %v1610_v59 = vpop.f32.mrf.mxu1 }
 0x3f9   : > { %v2003_v60 = vpack.c.bf16 %v1587_v54, %v1584_v6  ;;  %v2023_v1 = vpack.c.bf16 %v1619_v55, %v1616_v8  ;;  %v1579_v7 = vadd.f32 %v1946_v38, %v1578_v58  ;;  %v1611_v9 = vadd.f32 %v1946_v38, %v1610_v59 }
 0x3fa   : > { %v2193_v45 = vpop.f32.mrf.mxu0  ;;  %v2201_v2 = vpop.f32.mrf.mxu1 }
 0x3fb   : > { %2035 = vst [vmem:[%s2828_s8 + $0x8] sm:$0xff] %v2003_v60   ;;  %2039 = vst [vmem:[%s2828_s8 + $0x28] sm:$0xff] %v2023_v1   ;;  %v1998_v3 = vpack.c.bf16 %v1579_v7, %v1576_v56  ;;  %v2018_v4 = vpack.c.bf16 %v1611_v9, %v1608_v57  ;;  %v1600_v16 = vadd.f32 %v2193_v45, %v1946_v38 }
 0x3fc   : > { %v1591_v44 = vpop.f32.mrf.mxu0  ;;  %v1623_v5 = vpop.f32.mrf.mxu1  ;;  %v1632_v18 = vadd.f32 %v2201_v2, %v1946_v38 }
 0x3fd   : > { %1999 = vst [vmem:[%s2828_s8] sm:$0xff] %v1998_v3   ;;  %2038 = vst [vmem:[%s2828_s8 + $0x20] sm:$0xff] %v2018_v4   ;;  %v1592_v15 = vadd.f32 %v1946_v38, %v1591_v44  ;;  %v1624_v20 = vadd.f32 %v1946_v38, %v1623_v5 }
 0x3fe   : > { %v2194_v10 = vpop.f32.mrf.mxu0  ;;  %v2202_v11 = vpop.f32.mrf.mxu1 }
 0x3ff   : > { %v1603_v13 = vadd.f32 %v2194_v10, %v1946_v38  ;;  %v1635_v14 = vadd.f32 %v2202_v11, %v1946_v38 }
 0x400   : > { %v1594_v21 = vpop.f32.mrf.mxu0  ;;  %v1626_v22 = vpop.f32.mrf.mxu1 }
 0x401   : > { %v2013_v23 = vpack.c.bf16 %v1603_v13, %v1600_v16  ;;  %v2033_v24 = vpack.c.bf16 %v1635_v14, %v1632_v18  ;;  %v1595_v17 = vadd.f32 %v1946_v38, %v1594_v21  ;;  %v1627_v19 = vadd.f32 %v1946_v38, %v1626_v22 }
 0x403   : > { %2037 = vst [vmem:[%s2828_s8 + $0x18] sm:$0xff] %v2013_v23   ;;  %2041 = vst [vmem:[%s2828_s8 + $0x38] sm:$0xff] %v2033_v24   ;;  %v2008_v29 = vpack.c.bf16 %v1595_v17, %v1592_v15  ;;  %v2028_v30 = vpack.c.bf16 %v1627_v19, %v1624_v20 }
 0x405   : > { %2036 = vst [vmem:[%s2828_s8 + $0x10] sm:$0xff] %v2008_v29   ;;  %2040 = vst [vmem:[%s2828_s8 + $0x30] sm:$0xff] %v2028_v30  }
 0x406 PF: > { %s1994_s13 = sshll.u32 %s2566_s24, 10  ;;  %s3223_s10 = sld [smem:[#allocation26_spill]] }
 0x407   : > { %s1732_s30 = sshll.u32 %s2828_s8, 4  ;;  %s3224_s22 = sand.u32 1, %s2542_s18   ;;  %s3108_s30 = int_to_ptr.vmem [resolvable:$true] %s1732_s30 }
 0x408   : > { %s3112_s17 = scalar_lea.sflag [#allocation5], %s3224_s22  ;;  %s2454_s29 = scalar_lea.vmem %s3108_s30, 1024 }
 0x409   : > { %p2455_p6 = scmp.ne.s32.totalorder %s3108_s30, %s2454_s29  ;;  %s2587_s24 = smov [#allocation8]  }
 0x40a   : > { %s2458_s14 = sshll.u32 %s2587_s24, 4  ;;  %s2459_s14 = int_to_ptr.vmem [resolvable:$false] %s2458_s14 }
 0x40b   : > { %p2456_p7 = pnand %p2455_p6, %p2738_p12  ;;  %s2460_s11 = scalar_lea.vmem %s2459_s14, 2048 }
 0x40c   : > { %s3105_s15 = scalar_lea.hbm %s3223_s10, %s1994_s13  ;;  %p2461_p3 = scmp.lt.s32.totalorder %s3108_s30, %s2459_s14 }
 0x40d   : > { %p2457_p9 = pneg %p2456_p7  ;;  %p2462_p10 = scmp.lt.s32.totalorder %s2460_s11, %s2454_s29 }
 0x40f   : > { %p2463_p11 = por %p2462_p10, %p2461_p3 }
 0x411   : > { %p2464_p13 = pnand %p2463_p11, %p2457_p9 }
 0x413   : > { %2467 = shalt.err (!%p2464_p13)
}
 0x414   : > { %s2468_s8 = scalar_lea.hbm %s3105_s15, 1024  ;;  %s2472_s12 = scalar_lea.hbm %s3223_s10, 2048 }
 0x415   : > { %p2469_p0 = scmp.ne.s32.totalorder %s3105_s15, %s2468_s8  ;;  %p2473_p8 = scmp.lt.s32.totalorder %s3105_s15, %s3223_s10 }
 0x416   : > { %p2474_p1 = scmp.lt.s32.totalorder %s2472_s12, %s2468_s8 }
 0x417   : > { %p2470_p4 = pnand %p2469_p0, %p2738_p12 }
 0x418   : > { %p2475_p6 = por %p2474_p1, %p2473_p8 }
 0x419   : > { %p2471_p5 = pneg %p2470_p4 }
 0x41b   : > { %p2476_p7 = pnand %p2475_p6, %p2471_p5 }
 0x41d   : > { %2479 = shalt.err (!%p2476_p7)
}
 0x41e   : > { %s2588_s25 = smov 64   ;;  %s2589_s13 = smov 4  }
 0x41f   : > { %2229 = dma.vmem_to_hbm [thread:$0]  (%p2738_p12), %s3108_s30, 1024, %s3105_s15, %s3112_s17, %s2588_s25, %s2588_s25, %s2589_s13  }
 0x420 PF: > { %s3225_s28 = sld [smem:[#allocation12_spill]]  ;;  %p2243_p9 = scmp.ge.s32.totalorder %s2578_s27, 2 }
 0x422   : > { %p2239_p3 = pnand %p2243_p9, %p2748_p2 }
 0x424   : > { %p2240_p10 = pneg %p2239_p3 }
 0x426   : > { %s1747_s22 = sand.u32 1, %s3225_s28  }
 0x427   : > { %s1748_s29 = scalar_lea.sflag [#allocation5], %s1747_s22 }
 0x428   : > { %2533 = dma.done.wait (%p2240_p10), %s1748_s29, 1024  }
 0x429   : > { %2535 = vsyncadd (%p2240_p10), %s1748_s29, 4294966272  ;;  %s30_s27 = sadd.s32 1, %s2578_s27   ;;  %s3227_s24 = sld [smem:[#allocation13_spill]] }
 0x42a   : > { %p27_p11 = scmp.ge.s32.totalorder %s30_s27, 6   ;;  %s3228_s19 = sld [smem:[#allocation20_spill]] }
 0x42b   : > { %s3229_s23 = sld [smem:[#allocation14_spill]]  ;;  %s3235_s17 = smov %s2542_s18 }
 0x42c   : > { %s3230_s22 = sld [smem:[#allocation19_spill]]  ;;  %s3237_s20 = smov %s2554_s21 }
 0x42d   : > { %s3231_s15 = sld [smem:[#allocation15_spill]] }
 0x42e   : > { %s3232_s30 = sld [smem:[#allocation16_spill]] }
 0x42f   : > { %s3233_s25 = sld [smem:[#allocation17_spill]]  ;;  %s3236_s18 = smov %s3227_s24 }
 0x430   : > { %s3234_s26 = sld [smem:[#allocation18_spill]]  ;;  %29 = sbr.rel (!%p27_p11) target bundleno = 16 (0x10), region = 139 }
 0x431   : > { %s3238_s21 = smov %s3229_s23 }
 0x433   : > { %s3239_s23 = smov %s3231_s15 }
 0x434   : > { %s3240_s24 = smov %s3232_s30 }
 0x435   :  { %1753 = vsyncpa [#allocation4], 1 }
 0x436   :  { %1755 = vsyncpa [#allocation4 + $0x1], 1 }
 0x437   :  { %1756 = vsyncpa [#allocation7], 1 }
 0x438   :  { %1758 = vsyncpa [#allocation7 + $0x1], 1 }
 0x439   :  { %1759 = vsyncpa [#allocation5], 1 }
 0x43a   :  { %1761 = vsyncpa [#allocation5 + $0x1], 1 }

</bundles_post_ra>
